<compile_context>
chip_gen: v7x
topology: tpu7x:2x2x1
jax: 0.10.0
libtpu: 0.0.40
codegen_flags: <defaults>
</compile_context>

<pallas_src>
import functools

import jax
import jax.numpy as jnp
from jax import lax
from jax.experimental import pallas as pl
from jax.experimental.pallas import tpu as pltpu

# f32 matmuls on TPU default to reduced-precision MXU passes; request full
# precision so the kernel and the pure-JAX reference agree tightly.
jax.config.update("jax_default_matmul_precision", "highest")


def _pick_tile(batch_size, dim, *, target=256, vmem_budget=12 * 1024 * 1024):
    """Pick the row/column tile T (per half, the kernel works on 2T rows).

    Largest 8-aligned divisor of batch_size such that
      (a) there are >= 2 row blocks whenever possible, so the "parallel" row
          axis actually shards across v7x's two TensorCores, and
      (b) the estimated VMEM footprint stays well below the smallest default
          scoped-VMEM limit (v5e: 16 MiB), so no generation needs spilling.
    """

    def vmem_bytes(t):
        two_t = 2 * t
        inputs = 3 * two_t * dim * 4          # double-buffered input + q_scr
        temps = 5 * two_t * two_t * 4         # sim / exp / mask temporaries
        return inputs + temps

    cands = [t for t in range(8, batch_size + 1, 8) if batch_size % t == 0]
    if not cands:                             # tiny / odd batch: single block
        return batch_size
    multi = [t for t in cands if batch_size // t >= 2]
    pool = multi if multi else cands
    fitting = [t for t in pool if t <= target and vmem_bytes(t) <= vmem_budget]
    return max(fitting) if fitting else min(pool)


def _normalize_rows(z):
    """z / max(||z||, 1e-12) via rsqrt (matches torch F.normalize eps)."""
    z = z.astype(jnp.float32)
    sq = jnp.sum(z * z, axis=1, keepdims=True)
    return z * lax.rsqrt(jnp.maximum(sq, 1e-24))


def _ntxent_kernel(zn_ref, out_ref, q_scr, pos_scr, shift_scr, l_scr,
                   *, tile, inv_temp):
    T2 = 2 * tile
    ki = pl.program_id(1)
    nk = pl.num_programs(1)

    k_tile = zn_ref[...]                      # (2T, D) pre-normalized keys
    ones_row = jnp.ones((1, T2), jnp.float32)

    # ---- ki == 0: the rotated key block IS this row block's query rows.
    @pl.when(ki == 0)
    def _init():
        q_scr[...] = k_tile * inv_temp        # fold 1/temperature into queries
        l_scr[...] = jnp.zeros_like(l_scr)

    # ---- fused similarity tile on the MXU: sim[k, q] = <key_k, query_q>/temp
    sim = lax.dot_general(k_tile, q_scr[...], (((1,), (1,)), ((), ())),
                          preferred_element_type=jnp.float32)      # (2T, 2T)

    # ---- ki == 0 (diagonal tile): pull the self-similarity (the fixed LSE
    # shift) and the positive logit straight out of the MXU tile, laid out as
    # lane-dense (1, 2T) rows via ones-row matmuls on the idle MXU.
    @pl.when(ki == 0)
    def _extract_shift_and_positive():
        kk = lax.broadcasted_iota(jnp.int32, (T2, T2), 0)   # key index
        qq = lax.broadcasted_iota(jnp.int32, (T2, T2), 1)   # query index
        partner = jnp.where(qq < tile, qq + tile, qq - tile)
        diag_only = jnp.where(kk == qq, sim, 0.0)
        pos_only = jnp.where(kk == partner, sim, 0.0)
        shift_scr[...] = jnp.dot(ones_row, diag_only,
                                 preferred_element_type=jnp.float32)
        pos_scr[...] = jnp.dot(ones_row, pos_only,
                               preferred_element_type=jnp.float32)

    # ---- fixed-shift accumulation of sum(exp): shift is the per-row
    # self-similarity (~1/temperature), which upper-bounds every retained
    # logit, so no online max / exp-rescale is needed.  The per-row reduction
    # over keys is a ones-row matmul (MXU) instead of an XLU lane reduction.
    exp_t = jnp.exp(sim - shift_scr[...])                           # (2T, 2T)
    l_scr[...] += jnp.dot(ones_row, exp_t,
                          preferred_element_type=jnp.float32)

    # ---- last column block: swap the self term for the positive logit and
    # emit the per-row losses as a lane-dense (1, 2T) row.
    @pl.when(ki == nk - 1)
    def _finalize():
        shift = shift_scr[...]
        pos = pos_scr[...]
        # The ki == 0 tile contributed exp(self - shift) ~= 1 per row (shift
        # IS that tile's MXU diagonal); replace it with the positive logit.
        l = l_scr[...] + jnp.exp(pos - shift) - 1.0
        out_ref[...] = shift + jnp.log(l) - pos


def ntxent_loss(z_i, z_j, temperature=0.5):
    B, D = z_i.shape
    assert z_j.shape == (B, D)
    N = 2 * B
    T = _pick_tile(B, D)
    nb = B // T
    T2 = 2 * T

    # One-time O(N*D) pre-pass in plain JAX: row-normalize both views and lay
    # them out block-paired, so each (2T, D) tile = [T z_i rows ; matching T
    # z_j rows] and is one contiguous DMA.
    zn_i = _normalize_rows(z_i)
    zn_j = _normalize_rows(z_j)
    zn = jnp.concatenate([zn_i.reshape(nb, T, D), zn_j.reshape(nb, T, D)],
                         axis=1).reshape(N, D)

    kernel = functools.partial(_ntxent_kernel, tile=T,
                               inv_temp=1.0 / float(temperature))

    per_row = pl.pallas_call(
        kernel,
        out_shape=jax.ShapeDtypeStruct((nb, 1, T2), jnp.float32),
        grid_spec=pltpu.PrefetchScalarGridSpec(
            num_scalar_prefetch=0,
            grid=(nb, nb),                    # (row block, rotated col block)
            in_specs=[
                # Single rotated input stream: at ki == 0 the key block is
                # this row block's own rows (queries), cached in q_scr.
                pl.BlockSpec((T2, D), lambda qi, ki: ((qi + ki) % nb, 0)),
            ],
            out_specs=pl.BlockSpec((None, 1, T2), lambda qi, ki: (qi, 0, 0)),
            scratch_shapes=[
                pltpu.VMEM((T2, D), jnp.float32),   # scaled query tile
                pltpu.VMEM((1, T2), jnp.float32),   # positive logit per row
                pltpu.VMEM((1, T2), jnp.float32),   # fixed LSE shift per row
                pltpu.VMEM((1, T2), jnp.float32),   # running sum-exp per row
            ],
        ),
        # Row blocks are independent -> "parallel" (megacore on v7x); the
        # rotated column axis carries the reduction -> "arbitrary", kept last.
        compiler_params=pltpu.CompilerParams(
            dimension_semantics=("parallel", "arbitrary"),
            vmem_limit_bytes=32 * 1024 * 1024),
    )(zn)

    return jnp.sum(per_row) / N


def _ntxent_ref(z_i, z_j, temperature=0.5):
    # Pure-JAX reference (mirrors the PyTorch module exactly).
    B = z_i.shape[0]
    N = 2 * B
    z = jnp.concatenate([z_i, z_j], axis=0).astype(jnp.float32)
    zn = z / jnp.maximum(jnp.linalg.norm(z, axis=1, keepdims=True), 1e-12)
    sim = jnp.dot(zn, zn.T) / temperature
    pos = jnp.concatenate(
        [jnp.diagonal(sim, offset=B), jnp.diagonal(sim, offset=-B)],
        axis=0).reshape(N, 1)
    mask = (jnp.ones((N, N)) - jnp.eye(N)).astype(bool)
    neg = sim[mask].reshape(N, N - 1)
    logits = jnp.concatenate([pos, neg], axis=1)
    lse = jax.scipy.special.logsumexp(logits, axis=1)
    return jnp.sum(lse - logits[:, 0]) / N


if __name__ == "__main__":
    # Small shapes consistent with the module's forward: two (batch, dim)
    # embedding views.
    batch_size = 64
    dim = 32
    key = jax.random.PRNGKey(0)
    k1, k2 = jax.random.split(key)
    z_i = jax.random.normal(k1, (batch_size, dim), dtype=jnp.float32)
    z_j = jax.random.normal(k2, (batch_size, dim), dtype=jnp.float32)

    loss = jax.block_until_ready(ntxent_loss(z_i, z_j, temperature=0.5))
    ref = jax.block_until_ready(_ntxent_ref(z_i, z_j, temperature=0.5))
    assert jnp.allclose(loss, ref, rtol=1e-4, atol=1e-4), (loss, ref)

    print("KERNEL_OK")
</pallas_src>

<mosaic_0001>
module attributes {stable_mosaic.version = 11 : i64} {
  func.func @_ntxent_kernel(%arg0: i32, %arg1: i32, %arg2: memref<64x32xf32, #tpu.memory_space<vmem>>, %arg3: memref<1x1x64xf32, #tpu.memory_space<vmem>>, %arg4: memref<64x32xf32, #tpu.memory_space<vmem>>, %arg5: memref<1x64xf32, #tpu.memory_space<vmem>>, %arg6: memref<1x64xf32, #tpu.memory_space<vmem>>, %arg7: memref<1x64xf32, #tpu.memory_space<vmem>>) attributes {dimension_semantics = [#tpu.dimension_semantics<parallel>, #tpu.dimension_semantics<arbitrary>], iteration_bounds = array<i64: 2, 2>, scalar_prefetch = 0 : i64, scratch_operands = 4 : i64, tpu.core_type = #tpu.core_type<tc>, window_params = [{transform_indices = @transform_0, window_bounds = array<i64: 64, 32>}, {transform_indices = @transform_1, window_bounds = array<i64: 1, 1, 64>}]} {
    %c0 = arith.constant 0 : index
    %c0_0 = arith.constant 0 : index
    %0 = vector.load %arg2[%c0, %c0_0] : memref<64x32xf32, #tpu.memory_space<vmem>>, vector<64x32xf32>
    %cst = arith.constant 1.000000e+00 : f32
    %1 = vector.broadcast %cst : f32 to vector<1x64xf32>
    %c0_i32 = arith.constant 0 : i32
    %2 = arith.cmpi eq, %arg1, %c0_i32 : i32
    %3 = arith.extui %2 : i1 to i32
    %c0_i32_1 = arith.constant 0 : i32
    %4 = arith.cmpi ne, %3, %c0_i32_1 : i32
    scf.if %4 {
      %cst_15 = arith.constant 2.000000e+00 : f32
      %21 = vector.broadcast %cst_15 : f32 to vector<64x32xf32>
      %22 = arith.mulf %0, %21 : vector<64x32xf32>
      %c0_16 = arith.constant 0 : index
      %c0_17 = arith.constant 0 : index
      %23 = vector.load %arg4[%c0_16, %c0_17] : memref<64x32xf32, #tpu.memory_space<vmem>>, vector<64x32xf32>
      tpu.vector_store %arg4[%c0_16, %c0_17], %22 {strides = array<i32>} : memref<64x32xf32, #tpu.memory_space<vmem>>, vector<64x32xf32>,
      %cst_18 = arith.constant 0.000000e+00 : f32
      %24 = vector.broadcast %cst_18 : f32 to vector<1x64xf32>
      %c0_19 = arith.constant 0 : index
      %c0_20 = arith.constant 0 : index
      %25 = vector.load %arg7[%c0_19, %c0_20] : memref<1x64xf32, #tpu.memory_space<vmem>>, vector<1x64xf32>
      tpu.vector_store %arg7[%c0_19, %c0_20], %24 {strides = array<i32>} : memref<1x64xf32, #tpu.memory_space<vmem>>, vector<1x64xf32>,
    } else {
    }
    %c0_2 = arith.constant 0 : index
    %c0_3 = arith.constant 0 : index
    %5 = vector.load %arg4[%c0_2, %c0_3] : memref<64x32xf32, #tpu.memory_space<vmem>>, vector<64x32xf32>
    %cst_4 = arith.constant dense<0.000000e+00> : vector<64x64xf32>
    %6 = tpu.matmul %0, %5, %cst_4 {dimension_numbers = #tpu.dot_dimension_numbers<[1], [1], [0], [0], [0, 0, 1, 0], [], []>, precision = #tpu.contract_precision<fp32>} : vector<64x32xf32>, vector<64x32xf32>, vector<64x64xf32> -> vector<64x64xf32>
    %c0_i32_5 = arith.constant 0 : i32
    %7 = arith.cmpi eq, %arg1, %c0_i32_5 : i32
    %8 = arith.extui %7 : i1 to i32
    %c0_i32_6 = arith.constant 0 : i32
    %9 = arith.cmpi ne, %8, %c0_i32_6 : i32
    scf.if %9 {
      %21 = tpu.iota {dimensions = array<i32: 0>} : vector<64x64xi32>
      %22 = tpu.iota {dimensions = array<i32: 1>} : vector<64x64xi32>
      %c32_i32 = arith.constant 32 : i32
      %23 = vector.broadcast %c32_i32 : i32 to vector<64x64xi32>
      %24 = arith.cmpi slt, %22, %23 : vector<64x64xi32>
      %c32_i32_15 = arith.constant 32 : i32
      %25 = vector.broadcast %c32_i32_15 : i32 to vector<64x64xi32>
      %26 = arith.addi %22, %25 : vector<64x64xi32>
      %c32_i32_16 = arith.constant 32 : i32
      %27 = vector.broadcast %c32_i32_16 : i32 to vector<64x64xi32>
      %28 = arith.subi %22, %27 : vector<64x64xi32>
      %29 = arith.select %24, %26, %28 : vector<64x64xi1>, vector<64x64xi32>
      %30 = arith.cmpi eq, %21, %22 : vector<64x64xi32>
      %cst_17 = arith.constant 0.000000e+00 : f32
      %31 = vector.broadcast %cst_17 : f32 to vector<64x64xf32>
      %32 = arith.select %30, %6, %31 : vector<64x64xi1>, vector<64x64xf32>
      %33 = arith.cmpi eq, %21, %29 : vector<64x64xi32>
      %cst_18 = arith.constant 0.000000e+00 : f32
      %34 = vector.broadcast %cst_18 : f32 to vector<64x64xf32>
      %35 = arith.select %33, %6, %34 : vector<64x64xi1>, vector<64x64xf32>
      %cst_19 = arith.constant dense<0.000000e+00> : vector<1x64xf32>
      %36 = tpu.matmul %1, %32, %cst_19 {dimension_numbers = #tpu.dot_dimension_numbers<[1], [0], [0], [1], [0, 0, 1, 1], [], []>, precision = #tpu.contract_precision<fp32>} : vector<1x64xf32>, vector<64x64xf32>, vector<1x64xf32> -> vector<1x64xf32>
      %c0_20 = arith.constant 0 : index
      %c0_21 = arith.constant 0 : index
      %37 = vector.load %arg6[%c0_20, %c0_21] : memref<1x64xf32, #tpu.memory_space<vmem>>, vector<1x64xf32>
      tpu.vector_store %arg6[%c0_20, %c0_21], %36 {strides = array<i32>} : memref<1x64xf32, #tpu.memory_space<vmem>>, vector<1x64xf32>,
      %cst_22 = arith.constant dense<0.000000e+00> : vector<1x64xf32>
      %38 = tpu.matmul %1, %35, %cst_22 {dimension_numbers = #tpu.dot_dimension_numbers<[1], [0], [0], [1], [0, 0, 1, 1], [], []>, precision = #tpu.contract_precision<fp32>} : vector<1x64xf32>, vector<64x64xf32>, vector<1x64xf32> -> vector<1x64xf32>
      %c0_23 = arith.constant 0 : index
      %c0_24 = arith.constant 0 : index
      %39 = vector.load %arg5[%c0_23, %c0_24] : memref<1x64xf32, #tpu.memory_space<vmem>>, vector<1x64xf32>
      tpu.vector_store %arg5[%c0_23, %c0_24], %38 {strides = array<i32>} : memref<1x64xf32, #tpu.memory_space<vmem>>, vector<1x64xf32>,
    } else {
    }
    %c0_7 = arith.constant 0 : index
    %c0_8 = arith.constant 0 : index
    %10 = vector.load %arg6[%c0_7, %c0_8] : memref<1x64xf32, #tpu.memory_space<vmem>>, vector<1x64xf32>
    %11 = vector.broadcast %10 : vector<1x64xf32> to vector<64x64xf32>
    %12 = arith.subf %6, %11 : vector<64x64xf32>
    %13 = math.exp %12 : vector<64x64xf32>
    %c0_9 = arith.constant 0 : index
    %c0_10 = arith.constant 0 : index
    %14 = vector.load %arg7[%c0_9, %c0_10] : memref<1x64xf32, #tpu.memory_space<vmem>>, vector<1x64xf32>
    %cst_11 = arith.constant dense<0.000000e+00> : vector<1x64xf32>
    %15 = tpu.matmul %1, %13, %cst_11 {dimension_numbers = #tpu.dot_dimension_numbers<[1], [0], [0], [1], [0, 0, 1, 1], [], []>, precision = #tpu.contract_precision<fp32>} : vector<1x64xf32>, vector<64x64xf32>, vector<1x64xf32> -> vector<1x64xf32>
    %16 = arith.addf %14, %15 : vector<1x64xf32>
    %c0_12 = arith.constant 0 : index
    %c0_13 = arith.constant 0 : index
    %17 = vector.load %arg7[%c0_12, %c0_13] : memref<1x64xf32, #tpu.memory_space<vmem>>, vector<1x64xf32>
    tpu.vector_store %arg7[%c0_12, %c0_13], %16 {strides = array<i32>} : memref<1x64xf32, #tpu.memory_space<vmem>>, vector<1x64xf32>,
    %c1_i32 = arith.constant 1 : i32
    %18 = arith.cmpi eq, %arg1, %c1_i32 : i32
    %19 = arith.extui %18 : i1 to i32
    %c0_i32_14 = arith.constant 0 : i32
    %20 = arith.cmpi ne, %19, %c0_i32_14 : i32
    scf.if %20 {
      %c0_15 = arith.constant 0 : index
      %c0_16 = arith.constant 0 : index
      %21 = vector.load %arg6[%c0_15, %c0_16] : memref<1x64xf32, #tpu.memory_space<vmem>>, vector<1x64xf32>
      %c0_17 = arith.constant 0 : index
      %c0_18 = arith.constant 0 : index
      %22 = vector.load %arg5[%c0_17, %c0_18] : memref<1x64xf32, #tpu.memory_space<vmem>>, vector<1x64xf32>
      %c0_19 = arith.constant 0 : index
      %c0_20 = arith.constant 0 : index
      %23 = vector.load %arg7[%c0_19, %c0_20] : memref<1x64xf32, #tpu.memory_space<vmem>>, vector<1x64xf32>
      %24 = arith.subf %22, %21 : vector<1x64xf32>
      %25 = math.exp %24 : vector<1x64xf32>
      %26 = arith.addf %23, %25 : vector<1x64xf32>
      %cst_21 = arith.constant 1.000000e+00 : f32
      %27 = vector.broadcast %cst_21 : f32 to vector<1x64xf32>
      %28 = arith.subf %26, %27 : vector<1x64xf32>
      %29 = math.log %28 : vector<1x64xf32>
      %30 = arith.addf %21, %29 : vector<1x64xf32>
      %31 = arith.subf %30, %22 : vector<1x64xf32>
      %c0_22 = arith.constant 0 : index
      %c0_23 = arith.constant 0 : index
      %c0_24 = arith.constant 0 : index
      %32 = vector.load %arg3[%c0_22, %c0_23, %c0_24] : memref<1x1x64xf32, #tpu.memory_space<vmem>>, vector<1x1x64xf32>
      %33 = vector.shape_cast %32 : vector<1x1x64xf32> to vector<1x64xf32>
      %34 = vector.shape_cast %31 : vector<1x64xf32> to vector<1x1x64xf32>
      tpu.vector_store %arg3[%c0_22, %c0_23, %c0_24], %34 {strides = array<i32>} : memref<1x1x64xf32, #tpu.memory_space<vmem>>, vector<1x1x64xf32>,
    } else {
    }
    return
  }
  func.func @transform_0(%arg0: i32, %arg1: i32) -> (i32, i32) {
    %0 = arith.addi %arg0, %arg1 : i32
    %c2_i32 = arith.constant 2 : i32
    %c0_i32 = arith.constant 0 : i32
    %1 = arith.cmpi eq, %c2_i32, %c0_i32 : i32
    %c1_i32 = arith.constant 1 : i32
    %2 = arith.select %1, %c1_i32, %c2_i32 : i32
    %3 = arith.remsi %0, %2 : i32
    %c0_i32_0 = arith.constant 0 : i32
    %4 = arith.cmpi ne, %3, %c0_i32_0 : i32
    %c0_i32_1 = arith.constant 0 : i32
    %5 = arith.cmpi slt, %3, %c0_i32_1 : i32
    %c0_i32_2 = arith.constant 0 : i32
    %6 = arith.cmpi slt, %2, %c0_i32_2 : i32
    %7 = arith.xori %5, %6 : i1
    %8 = arith.andi %7, %4 : i1
    %9 = arith.addi %3, %2 : i32
    %10 = arith.select %8, %9, %3 : i32
    %c0_i32_3 = arith.constant 0 : i32
    %c0_i32_4 = arith.constant 0 : i32
    return %10, %c0_i32_3 : i32, i32
  }
  func.func @transform_1(%arg0: i32, %arg1: i32) -> (i32, i32, i32) {
    %c0_i32 = arith.constant 0 : i32
    %c0_i32_0 = arith.constant 0 : i32
    %c0_i32_1 = arith.constant 0 : i32
    return %arg0, %c0_i32, %c0_i32_0 : i32, i32, i32
  }
}

</mosaic_0001>

<bundles_post_ra>
// kernel: tpu_custom_call.1
= control target key start
LH: loop header
LB: loop body
LE: loop exit
PB: predicated region body
PF: predicated region fallthrough
CT: control target
= control target key end

     0   :  { %6 = vsyncpa [#allocation7], 0  ;;  %s5203_s0 = inlined_call_operand.vmem [shape: f32[128,32], index: 0, kind: input, shape index: {}]   ;;  %s5204_s1 = inlined_call_operand.hbm [shape: f32[2,1,64], index: 1, kind: output, shape index: {}]  }
   0x1   :  { %8 = vsyncpa [#allocation7 + $0x1], 0  ;;  %s4342_s6 = smov 0   ;;  %s4344_s7 = smov 0  }
   0x2   :  { %s4346_s8 = smov 0   ;;  %s4348_s9 = smov 0  }
   0x3   :  { %s4350_s10 = smov 0   ;;  %s4352_s11 = smov 0  }
   0x4   :  { %s4354_s12 = smov 0   ;;  %s4356_s13 = smov 0  }
   0x5 LB: > { %s2948_s14 = sadd.s32 4294967295, %s4318_s13   ;;  %s2949_s15 = sadd.s32 4294967294, %s4318_s13   ;;  %s4318_s13 = sphi %s4356_s13, %s14_s13   ;;  %s4314_s12 = sphi %s4354_s12, %s5223_s12   ;;  %s4310_s11 = sphi %s4352_s11, %s5222_s11   ;;  %s4306_s10 = sphi %s4350_s10, %s5221_s10   ;;  %s4302_s9 = sphi %s4348_s9, %s5220_s9   ;;  %s4298_s8 = sphi %s4346_s8, %s5219_s8   ;;  %s4294_s7 = sphi %s4344_s7, %s5218_s7   ;;  %s4290_s6 = sphi %s4342_s6, %s5217_s6  }
   0x6   : > { %s23_s16 = sadd.s32 1, %s4310_s11  ;;  %s26_s17 = sadd.s32 1, %s4314_s12 }
   0x7   : > { %p24_p0 = scmp.ge.s32.totalorder %s23_s16, 2  ;;  %p95_p1 = scmp.ne.s32.totalorder %s4298_s8, %s4294_s7 }
   0x8   : > { %p96_p2 = scmp.eq.s32.totalorder %s2948_s14, 3  ;;  %p101_p4 = scmp.ne.s32.totalorder %s4294_s7, %s4290_s6 }
   0x9   : > { %s5225_s16 = smov (%p24_p0, %s23_s16), 0  ;;  %s5227_s17 = smov (!%p24_p0, %s26_s17), %s4314_s12 }
   0xa   : > { %p4391_p3 = por %p96_p2, %p95_p1  ;;  %p28_p5 = scmp.ge.s32.totalorder %s5227_s17, 2 }
   0xb   : > { %p102_p6 = scmp.eq.s32.totalorder %s2949_s15, 3  ;;  %p2958_p7 = scmp.ge.s32.totalorder %s4318_s13, 1 }
   0xc   : > { %p155_p8 = scmp.lt.s32.totalorder %s4318_s13, 5  ;;  %s5229_s17 = smov (%p28_p5, %s5227_s17), 0 }
   0xd   : > { %p4401_p9 = por %p102_p6, %p101_p4  ;;  %s82_s20 = ssub.s32 %s4314_s12, %s5229_s17 }
   0xe   : > { %p156_p10 = pnand %p2958_p7, %p155_p8  ;;  %s85_s21 = sadd.s32 1, %s4298_s8 }
   0xf   : > { %p83_p11 = scmp.eq.s32.totalorder %s82_s20, 0  ;;  %s185_s23 = sand.u32 (!%p156_p10), 1, %s4294_s7  }
  0x10   : > { %159 = sbr.rel (%p156_p10) target bundleno = 1032 (0x408), region = 24  ;;  %s187_s24 = sadd.s32 (!%p156_p10), %s4302_s9, %s4306_s10 }
  0x11   : > { %s4409_s22 = scalar_select %p83_p11, %s4298_s8, %s85_s21  }
  0x12   : > { %p188_p12 = scmp.lt.s32.totalorder (!%p156_p10), %s187_s24, 0  ;;  %s189_s25 = ssub.s32 (!%p156_p10), 0, %s187_s24 }
  0x13   : > { %s2959_s26 = smin.u32 (!%p156_p10), %s189_s25, %s187_s24  ;;  %s4433_s14 = scalar_lea.vmem (!%p156_p10), [#allocation6], %s185_s23 }
  0x14   : > { %s191_s27 = sand.u32 (!%p156_p10), 1, %s2959_s26   ;;  %p2964_p1 = scmp.ne.s32.totalorder (!%p156_p10), %s4302_s9, 0 }
  0x15   : > { %s192_s28 = ssub.s32 (!%p156_p10), 0, %s191_s27 }
  0x17   : > { %s5231_s28 = smov (!%p188_p12, %s192_s28), %s191_s27  ;;  %vm239_vm0 = vcmask (!%p2964_p1), 261120   ;;  %vm248_vm1 = vcmask (!%p2964_p1), 516096   ;;  %v4320_v16 = vmov (!%p2964_p1), 0.0  }
  0x18   : > { %p2961_p13 = scmp.lt.s32.totalorder %s5231_s28, 0  ;;  %s198_s29 = sadd.s32 2, %s5231_s28  ;;  %249 = vst.msk [vmem:[#allocation5] sm:$0x1] (!%p2964_p1), %vm248_vm1, %v4320_v16 }
  0x1a   : > { %s5233_s29 = smov (!%p2961_p13, %s198_s29), %s5231_s28 }
  0x1b   : > { %s2962_s30 = sshll.u32 %s5233_s29, 3 }
  0x1c   : > { %p201_p0 = scmp.lt.s32.totalorder %s2962_s30, 15 }
  0x1d   : > { %230 = sbr.rel (%p2964_p1) target bundleno = 40 (0x28), region = 28 }
  0x1e   : > { %s5235_s30 = smov (!%p201_p0, %s2962_s30), 15 }
  0x1f   : > { %s2963_s2 = sshll.u32 %s5235_s30, 3 }
  0x20   : > { %s204_s5 = scalar_lea.vmem %s5203_s0, %s2963_s2 }
  0x21   : > { %v219_v0 = vld [vmem:[%s204_s5] sm:$0xff]  ;;  %v4417_v1 = vld [vmem:[%s204_s5 + $0x8] sm:$0xff]  ;;  %v4419_v2 = vld [vmem:[%s204_s5 + $0x10] sm:$0xff] }
  0x22   : > { %v4421_v3 = vld [vmem:[%s204_s5 + $0x18] sm:$0xff]  ;;  %v4423_v4 = vld [vmem:[%s204_s5 + $0x20] sm:$0xff]  ;;  %v4425_v5 = vld [vmem:[%s204_s5 + $0x28] sm:$0xff]  ;;  %v231_v8 = vmul.f32 (!%p2964_p1), 2.0, %v219_v0  ;;  %v232_v9 = vmul.f32 (!%p2964_p1), 2.0, %v4417_v1  ;;  %v233_v10 = vmul.f32 (!%p2964_p1), 2.0, %v4419_v2 }
  0x23   : > { %v4427_v6 = vld [vmem:[%s204_s5 + $0x30] sm:$0xff]  ;;  %v4429_v7 = vld [vmem:[%s204_s5 + $0x38] sm:$0xff]  ;;  %v234_v11 = vmul.f32 (!%p2964_p1), 2.0, %v4421_v3  ;;  %v235_v12 = vmul.f32 (!%p2964_p1), 2.0, %v4423_v4  ;;  %v236_v13 = vmul.f32 (!%p2964_p1), 2.0, %v4425_v5 }
  0x24   : > { %v237_v14 = vmul.f32 2.0, %v4427_v6  ;;  %240 = vst.msk [vmem:[#allocation2] sm:$0xff] %vm239_vm0, %v231_v8  ;;  %241 = vst.msk [vmem:[#allocation2 + $0x8] sm:$0xff] %vm239_vm0, %v232_v9  ;;  %v238_v15 = vmul.f32 2.0, %v4429_v7 }
  0x25   : > { %242 = vst.msk [vmem:[#allocation2 + $0x10] sm:$0xff] %vm239_vm0, %v233_v10  ;;  %243 = vst.msk [vmem:[#allocation2 + $0x18] sm:$0xff] %vm239_vm0, %v234_v11 }
  0x26   : > { %244 = vst.msk [vmem:[#allocation2 + $0x20] sm:$0xff] %vm239_vm0, %v235_v12  ;;  %245 = vst.msk [vmem:[#allocation2 + $0x28] sm:$0xff] %vm239_vm0, %v236_v13 }
  0x27   : > { %246 = vst.msk [vmem:[#allocation2 + $0x30] sm:$0xff] %vm239_vm0, %v237_v14  ;;  %247 = vst.msk [vmem:[#allocation2 + $0x38] sm:$0xff] %vm239_vm0, %v238_v15 }
  0x28 PF: > { %vm258_vm2 = vcmask 261120   ;;  %vm1195_vm3 = vcmask (!%p2964_p1), 523264   ;;  %vm4322_vm4 = vmmov (!%p2964_p1), 0  }
  0x29   : > { %v260_v35 = vsel %vm258_vm2, %v219_v0, 0  ;;  %v263_v52 = vsel %vm258_vm2, %v4417_v1, 0  ;;  %v266_v56 = vsel %vm258_vm2, %v4419_v2, 0  ;;  %v269_v59 = vsel %vm258_vm2, %v4421_v3, 0 }
  0x2a   : > { %v4466_v36 = vand.u32 4294901760, %v260_v35  ;;  %v4499_v55 = vand.u32 4294901760, %v263_v52  ;;  %v272_v63 = vsel %vm258_vm2, %v4423_v4, 0  ;;  %v4519_v0 = vand.u32 4294901760, %v266_v56 }
  0x2b   : > { %v4524_v2 = vand.u32 4294901760, %v269_v59  ;;  %v4528_v3 = vand.u32 4294901760, %v272_v63  ;;  %v275_v8 = vsel %vm258_vm2, %v4425_v5, 0  ;;  %v278_v5 = vsel %vm258_vm2, %v4427_v6, 0 }
  0x2c   : > { %v252_v19 = vld [vmem:[#allocation2 + $0x10] sm:$0xff]  ;;  %v253_v22 = vld [vmem:[#allocation2 + $0x18] sm:$0xff]  ;;  %v4473_v41 = vsub.f32 %v260_v35, %v4466_v36  ;;  %v4522_v1 = vsub.f32 %v263_v52, %v4499_v55  ;;  %v4537_v12 = vsub.f32 %v266_v56, %v4519_v0  ;;  %v4543_v15 = vand.u32 4294901760, %v275_v8 }
  0x2d   : > { %v290_v23 = vsel %vm258_vm2, %v252_v19, 0  ;;  %v293_v26 = vsel %vm258_vm2, %v253_v22, 0  ;;  %v254_v28 = vld [vmem:[#allocation2 + $0x20] sm:$0xff]  ;;  %v255_v29 = vld [vmem:[#allocation2 + $0x28] sm:$0xff]  ;;  %v4541_v14 = vsub.f32 %v269_v59, %v4524_v2  ;;  %v281_v19 = vsel %vm258_vm2, %v4429_v7, 0 }
  0x2e   : > { %v314_v27 = vand.u32 4294901760, %v290_v23  ;;  %v317_v30 = vand.u32 4294901760, %v293_v26  ;;  %v296_v33 = vsel %vm258_vm2, %v254_v28, 0  ;;  %v299_v34 = vsel %vm258_vm2, %v255_v29, 0  ;;  %v256_v39 = vld [vmem:[#allocation2 + $0x30] sm:$0xff]  ;;  %v257_v40 = vld [vmem:[#allocation2 + $0x38] sm:$0xff] }
  0x2f   : > { %v250_v17 = vld [vmem:[#allocation2] sm:$0xff]  ;;  %v251_v18 = vld [vmem:[#allocation2 + $0x8] sm:$0xff]  ;;  %v320_v37 = vand.u32 4294901760, %v296_v33  ;;  %v323_v38 = vand.u32 4294901760, %v299_v34  ;;  %v382_v42 = vand.u32 4294901760, %v4473_v41  ;;  %v4477_v43 = vsel %vm258_vm2, %v256_v39, 0 }
  0x30   : > { %v284_v20 = vsel %vm258_vm2, %v250_v17, 0  ;;  %v287_v21 = vsel %vm258_vm2, %v251_v18, 0  ;;  %v4459_v32 = vpack.c.bf16 %v317_v30, %v314_v27  ;;  %v4480_v44 = vsel %vm258_vm2, %v257_v40, 0 }
  0x31   : > { %v308_v24 = vand.u32 4294901760, %v284_v20  ;;  %v311_v25 = vand.u32 4294901760, %v287_v21  ;;  %v4482_v45 = vpack.c.bf16 %v323_v38, %v320_v37  ;;  %v383_v46 = vsub.f32 %v4473_v41, %v382_v42  ;;  %3340 = vmatprep.mubr.f32.mxu0 %v382_v42 }
  0x32   : > { %v326_v50 = vand.u32 4294901760, %v4477_v43  ;;  %v329_v51 = vand.u32 4294901760, %v4480_v44  ;;  %v4509_v58 = vsub.f32 %v290_v23, %v314_v27  ;;  %v4515_v62 = vsub.f32 %v293_v26, %v317_v30 }
  0x33   : > { %v4457_v31 = vpack.c.bf16 %v311_v25, %v308_v24  ;;  %v4485_v47 = vsub.f32 %v284_v20, %v308_v24  ;;  %v4487_v48 = vsub.f32 %v287_v21, %v311_v25  ;;  %v384_v49 = vand.u32 4294901760, %v383_v46 }
  0x34   : > { %v4507_v57 = vpack.c.bf16 %v329_v51, %v326_v50  ;;  %v477_v10 = vand.u32 4294901760, %v4509_v58  ;;  %v484_v11 = vand.u32 4294901760, %v4515_v62  ;;  %v392_v13 = vand.u32 4294901760, %v4522_v1 }
  0x35   : > { %3751 = vmatprep.subr.bf16.mxu1 %v4457_v31  ;;  %3799 = vmatprep.subr.bf16.mxu0 %v4457_v31  ;;  %v463_v53 = vand.u32 4294901760, %v4485_v47  ;;  %v470_v54 = vand.u32 4294901760, %v4487_v48  ;;  %v4547_v16 = vsub.f32 %v296_v33, %v320_v37  ;;  %v4549_v17 = vsub.f32 %v299_v34, %v323_v38 }
  0x36   : > { %3753 = vmatpush3.bf16.xpose.msra.mxu1 %v4457_v31  ;;  %3801 = vmatpush3.bf16.xpose.msra.mxu0 %v4457_v31  ;;  %v4552_v18 = vsub.f32 %v272_v63, %v4528_v3  ;;  %v478_v22 = vsub.f32 %v4509_v58, %v477_v10  ;;  %v485_v23 = vsub.f32 %v4515_v62, %v484_v11  ;;  %v402_v24 = vand.u32 4294901760, %v4537_v12 }
  0x37   : > { %3755 = vmatprep.subr.bf16.mxu1 %v4459_v32  ;;  %3803 = vmatprep.subr.bf16.mxu0 %v4459_v32  ;;  %v464_v60 = vsub.f32 %v4485_v47, %v463_v53  ;;  %v471_v61 = vsub.f32 %v4487_v48, %v470_v54  ;;  %v3814_v21 = vpack.c.bf16 %v470_v54, %v463_v53  ;;  %v4559_v25 = vand.u32 4294901760, %v278_v5 }
  0x38   : > { %3256 = vmatprep.mubr.f32.mxu1 %v384_v49  ;;  %v393_v6 = vsub.f32 %v4522_v1, %v392_v13  ;;  %v412_v26 = vand.u32 4294901760, %v4541_v14  ;;  %v4564_v27 = vsub.f32 %v275_v8, %v4543_v15  ;;  %v4566_v28 = vand.u32 4294901760, %v281_v19 }
  0x39   : > { %v465_v4 = vand.u32 4294901760, %v464_v60  ;;  %v472_v9 = vand.u32 4294901760, %v471_v61  ;;  %v491_v7 = vand.u32 4294901760, %v4547_v16  ;;  %v422_v29 = vand.u32 4294901760, %v4552_v18 }
  0x3a   : > { %v479_v30 = vand.u32 4294901760, %v478_v22  ;;  %v486_v33 = vand.u32 4294901760, %v485_v23  ;;  %v498_v34 = vand.u32 4294901760, %v4549_v17  ;;  %v403_v35 = vsub.f32 %v4537_v12, %v402_v24 }
  0x3b   : > { %v3766_v20 = vpack.c.bf16 %v472_v9, %v465_v4  ;;  %v4575_v37 = vsub.f32 %v278_v5, %v4559_v25  ;;  %v394_v38 = vand.u32 4294901760, %v393_v6  ;;  %v413_v39 = vsub.f32 %v4541_v14, %v412_v26 }
  0x3c   : > { %v432_v40 = vand.u32 4294901760, %v4564_v27  ;;  %v4580_v42 = vsub.f32 %v281_v19, %v4566_v28  ;;  %v3818_v46 = vpack.c.bf16 %v484_v11, %v477_v10  ;;  %v492_v49 = vsub.f32 %v4547_v16, %v491_v7 }
  0x3d   : > { %v423_v52 = vsub.f32 %v4552_v18, %v422_v29  ;;  %v3770_v53 = vpack.c.bf16 %v486_v33, %v479_v30  ;;  %v499_v54 = vsub.f32 %v4549_v17, %v498_v34  ;;  %v4588_v56 = vsub.f32 %v4477_v43, %v326_v50 }
  0x3e   : > { %3757 = vmatpush3.bf16.xpose.msra.mxu1 %v4459_v32  ;;  %3805 = vmatpush3.bf16.xpose.msra.mxu0 %v4459_v32  ;;  %v4593_v59 = vsub.f32 %v4480_v44, %v329_v51  ;;  %v404_v60 = vand.u32 4294901760, %v403_v35  ;;  %v442_v61 = vand.u32 4294901760, %v4575_v37  ;;  %v414_v63 = vand.u32 4294901760, %v413_v39 }
  0x3f   : > { %3759 = vmatprep.subr.bf16.mxu1 %v4482_v45  ;;  %3807 = vmatprep.subr.bf16.mxu0 %v4482_v45  ;;  %v433_v8 = vsub.f32 %v4564_v27, %v432_v40  ;;  %v452_v4 = vand.u32 4294901760, %v4580_v42  ;;  %v424_v9 = vand.u32 4294901760, %v423_v52  ;;  %v493_v43 = vand.u32 4294901760, %v492_v49 }
  0x40   : > { %v500_v50 = vand.u32 4294901760, %v499_v54  ;;  %v505_v44 = vand.u32 4294901760, %v4588_v56  ;;  %v512_v51 = vand.u32 4294901760, %v4593_v59  ;;  %v443_v10 = vsub.f32 %v4575_v37, %v442_v61 }
  0x41   : > { %v434_v11 = vand.u32 4294901760, %v433_v8  ;;  %v3822_v19 = vpack.c.bf16 %v498_v34, %v491_v7  ;;  %v3786_v30 = vpack.c.bf16 %v4515_v62, %v4509_v58  ;;  %v1148_v35 = vlaneseq (!%p2964_p1) }
  0x42   : > { %v3774_v5 = vpack.c.bf16 %v500_v50, %v493_v43  ;;  %v444_v22 = vand.u32 4294901760, %v443_v10  ;;  %v3826_v7 = vpack.c.bf16 %v512_v51, %v505_v44 }
  0x43   : > { %v4674_v39 = vand.u32 (!%p2964_p1), 127, %v1148_v35 }
  0x45   : > { %vm1159_vm6 = vcmp.lt.s32.totalorder (!%p2964_p1), %v4674_v39, 32 }
  0x46   : > { %3761 = vmatpush3.bf16.xpose.msra.mxu1 %v4482_v45  ;;  %3809 = vmatpush3.bf16.xpose.msra.mxu0 %v4482_v45 }
  0x47   : > { %3763 = vmatprep.subr.bf16.mxu1 %v4507_v57  ;;  %3811 = vmatprep.subr.bf16.mxu0 %v4507_v57 }
  0x4e   : > { %3765 = vmatpush3.bf16.xpose.msra.mxu1 %v4507_v57  ;;  %3813 = vmatpush3.bf16.xpose.msra.mxu0 %v4507_v57 }
  0x4f   : > { %3767 = vmatprep.subr.bf16.mxu1 %v3766_v20  ;;  %3815 = vmatprep.subr.bf16.mxu0 %v3814_v21 }
  0x55   : > { %3257 = vmatmul.mubr.f32.vlgmr.msra.gmra.mrb[0].mxu1 %v394_v38  ;;  %3341 = vmatmul.mubr.f32.vlgmr.msra.gmra.mrb[0].mxu0 %v392_v13  ;;  %v453_v13 = vsub.f32 %v4580_v42, %v452_v4  ;;  %v4672_v38 = vshrl.u32 (!%p2964_p1), %v1148_v35, 7 }
  0x56   : > { %3769 = vmatpush3.bf16.xpose.msra.mxu1 %v3766_v20  ;;  %3817 = vmatpush3.bf16.xpose.msra.mxu0 %v3814_v21  ;;  %v506_v20 = vsub.f32 %v4588_v56, %v505_v44  ;;  %v513_v21 = vsub.f32 %v4593_v59, %v512_v51 }
  0x57   : > { %3771 = vmatprep.subr.bf16.mxu1 %v3770_v53  ;;  %3819 = vmatprep.subr.bf16.mxu0 %v3818_v46  ;;  %v454_v23 = vand.u32 4294901760, %v453_v13  ;;  %v1150_v52 = vadd.s32 (!%p2964_p1), 8, %v4672_v38  ;;  %vm1163_vm5 = vcmp.eq.s32.totalorder (!%p2964_p1), %v4672_v38, %v4674_v39  ;;  %v1154_v8 = vadd.s32 (!%p2964_p1), 40, %v4672_v38 }
  0x58   : > { %3259 = vmatprep.mubr.f32.mxu1 %v404_v60  ;;  %3343 = vmatprep.mubr.f32.mxu0 %v402_v24  ;;  %v507_v24 = vand.u32 4294901760, %v506_v20  ;;  %v514_v6 = vand.u32 4294901760, %v513_v21  ;;  %v1152_v60 = vadd.s32 (!%p2964_p1), 24, %v4672_v38 }
  0x59   : > { %3260 = vmatmul.mubr.f32.gmra.mrb[2].mxu1 %v414_v63  ;;  %3344 = vmatmul.mubr.f32.gmra.mrb[2].mxu0 %v412_v26  ;;  %vm1164_vm7 = vcmp.eq.s32.totalorder (!%p2964_p1), %v1150_v52, %v4674_v39  ;;  %v1153_v63 = vadd.s32 (!%p2964_p1), 32, %v4672_v38  ;;  %vm1168_vm15 = vcmp.eq.s32.totalorder (!%p2964_p1), %v1154_v8, %v4674_v39 }
  0x5a   : > { %3262 = vmatprep.mubr.f32.mxu1 %v424_v9  ;;  %3346 = vmatprep.mubr.f32.mxu0 %v422_v29  ;;  %v3778_v26 = vpack.c.bf16 %v514_v6, %v507_v24  ;;  %v3782_v29 = vpack.c.bf16 %v4487_v48, %v4485_v47  ;;  %v3790_v47 = vpack.c.bf16 %v4549_v17, %v4547_v16 }
  0x5b   : > { %vm1166_vm9 = vcmp.eq.s32.totalorder (!%p2964_p1), %v1152_v60, %v4674_v39  ;;  %vm1167_vm14 = vcmp.eq.s32.totalorder (!%p2964_p1), %v1153_v63, %v4674_v39 }
  0x5d   : > { %3263 = vmatmul.mubr.f32.gmra.mrb[4].mxu1 %v434_v11  ;;  %3347 = vmatmul.mubr.f32.gmra.mrb[4].mxu0 %v432_v40  ;;  %v4323_v40 = vmov (!%p2964_p1), 0.0  }
  0x5e   : > { %3773 = vmatpush3.bf16.xpose.msra.mxu1 %v3770_v53  ;;  %3821 = vmatpush3.bf16.xpose.msra.mxu0 %v3818_v46  ;;  %v1160_v53 = vadd.s32 (!%p2964_p1), 32, %v4674_v39 }
  0x5f   : > { %3775 = vmatprep.subr.bf16.mxu1 %v3774_v5  ;;  %3823 = vmatprep.subr.bf16.mxu0 %v3822_v19 }
  0x60   : > { %3265 = vmatprep.mubr.f32.mxu1 %v444_v22  ;;  %3349 = vmatprep.mubr.f32.mxu0 %v442_v61 }
  0x61   : > { %3266 = vmatmul.mubr.f32.gmra.mrb[6].mxu1 %v454_v23  ;;  %3350 = vmatmul.mubr.f32.gmra.mrb[6].mxu0 %v452_v4 }
  0x62   : > { %3284 = vmatprep.mubr.f32.mxu1 %v4466_v36  ;;  %3368 = vmatprep.mubr.f32.mxu0 %v4466_v36 }
  0x66   : > { %3777 = vmatpush3.bf16.xpose.msra.mxu1 %v3774_v5  ;;  %3825 = vmatpush3.bf16.xpose.msra.mxu0 %v3822_v19 }
  0x67   : > { %3779 = vmatprep.subr.bf16.mxu1 %v3778_v26  ;;  %3827 = vmatprep.subr.bf16.mxu0 %v3826_v7 }
  0x6e   : > { %3781 = vmatpush3.bf16.xpose.msra.mxu1 %v3778_v26  ;;  %3829 = vmatpush3.bf16.xpose.msra.mxu0 %v3826_v7 }
  0x6f   : > { %3783 = vmatprep.subr.bf16.mxu1 %v3782_v29  ;;  %3831 = vmatprep.subr.bf16.mxu0 %v4457_v31 }
  0x75   : > { %3285 = vmatmul.mubr.f32.vlgmr.msra.gmra.mrb[0].mxu1 %v4499_v55  ;;  %3369 = vmatmul.mubr.f32.vlgmr.msra.gmra.mrb[0].mxu0 %v4499_v55 }
  0x76   : > { %3785 = vmatpush3.bf16.xpose.msra.mxu1 %v3782_v29  ;;  %3833 = vmatpush3.bf16.xpose.msra.mxu0 %v4457_v31  ;;  %v3794_v31 = vpack.c.bf16 %v4593_v59, %v4588_v56  ;;  %v2966_v56 = vadd.s32 (!%p2964_p1), 4294967264, %v4674_v39  ;;  %v1151_v59 = vadd.s32 (!%p2964_p1), 16, %v4672_v38 }
  0x77   : > { %3787 = vmatprep.subr.bf16.mxu1 %v3786_v30  ;;  %3835 = vmatprep.subr.bf16.mxu0 %v4459_v32 }
  0x78   : > { %3287 = vmatprep.mubr.f32.mxu1 %v4519_v0  ;;  %3371 = vmatprep.mubr.f32.mxu0 %v4519_v0  ;;  %v4696_v9 = vsel (!%p2964_p1), %vm1159_vm6, %v1160_v53, %v2966_v56  ;;  %vm1165_vm8 = vcmp.eq.s32.totalorder (!%p2964_p1), %v1151_v59, %v4674_v39 }
  0x79   : > { %3288 = vmatmul.mubr.f32.gmra.mrb[2].mxu1 %v4524_v2  ;;  %3372 = vmatmul.mubr.f32.gmra.mrb[2].mxu0 %v4524_v2  ;;  %vm1179_vm10 = vcmp.eq.s32.totalorder (!%p2964_p1), %v4672_v38, %v4696_v9  ;;  %vm1180_vm11 = vcmp.eq.s32.totalorder (!%p2964_p1), %v1150_v52, %v4696_v9  ;;  %vm1181_vm12 = vcmp.eq.s32.totalorder (!%p2964_p1), %v1151_v59, %v4696_v9 }
  0x7a   : > { %3290 = vmatprep.mubr.f32.mxu1 %v4528_v3  ;;  %3374 = vmatprep.mubr.f32.mxu0 %v4528_v3  ;;  %vm1182_vm13 = vcmp.eq.s32.totalorder (!%p2964_p1), %v1152_v60, %v4696_v9  ;;  %vm1183_vm0 = vcmp.eq.s32.totalorder (!%p2964_p1), %v1153_v63, %v4696_v9  ;;  %vm1184_vm1 = vcmp.eq.s32.totalorder (!%p2964_p1), %v1154_v8, %v4696_v9 }
  0x7d   : > { %3291 = vmatmul.mubr.f32.gmra.mrb[4].mxu1 %v4543_v15  ;;  %3375 = vmatmul.mubr.f32.gmra.mrb[4].mxu0 %v4543_v15 }
  0x7e   : > { %3789 = vmatpush3.bf16.xpose.msra.mxu1 %v3786_v30  ;;  %3837 = vmatpush3.bf16.xpose.msra.mxu0 %v4459_v32 }
  0x7f   : > { %3791 = vmatprep.subr.bf16.mxu1 %v3790_v47  ;;  %3839 = vmatprep.subr.bf16.mxu0 %v4482_v45 }
  0x80   : > { %3293 = vmatprep.mubr.f32.mxu1 %v4559_v25  ;;  %3377 = vmatprep.mubr.f32.mxu0 %v4559_v25 }
  0x81   : > { %3294 = vmatmul.mubr.f32.gmra.mrb[6].mxu1 %v4566_v28  ;;  %3378 = vmatmul.mubr.f32.gmra.mrb[6].mxu0 %v4566_v28 }
  0x82   : > { %3312 = vmatprep.mubr.f32.mxu1 %v4473_v41  ;;  %3396 = vmatprep.mubr.f32.mxu0 %v4466_v36 }
  0x86   : > { %3793 = vmatpush3.bf16.xpose.msra.mxu1 %v3790_v47  ;;  %3841 = vmatpush3.bf16.xpose.msra.mxu0 %v4482_v45 }
  0x87   : > { %3795 = vmatprep.subr.bf16.mxu1 %v3794_v31  ;;  %3843 = vmatprep.subr.bf16.mxu0 %v4507_v57 }
  0x8e   : > { %3797 = vmatpush3.bf16.xpose.msra.mxu1 %v3794_v31  ;;  %3845 = vmatpush3.bf16.xpose.msra.mxu0 %v4507_v57 }
  0x95   : > { %3313 = vmatmul.mubr.f32.vlgmr.msra.gmra.mrb[0].mxu1 %v4522_v1  ;;  %3397 = vmatmul.mubr.f32.vlgmr.msra.gmra.mrb[0].mxu0 %v4499_v55 }
  0x96   : > { %3315 = vmatprep.mubr.f32.mxu1 %v4537_v12  ;;  %3399 = vmatprep.mubr.f32.mxu0 %v4519_v0 }
  0x99   : > { %3316 = vmatmul.mubr.f32.gmra.mrb[2].mxu1 %v4541_v14  ;;  %3400 = vmatmul.mubr.f32.gmra.mrb[2].mxu0 %v4524_v2 }
  0x9a   : > { %3318 = vmatprep.mubr.f32.mxu1 %v4552_v18  ;;  %3402 = vmatprep.mubr.f32.mxu0 %v4528_v3 }
  0x9d   : > { %3319 = vmatmul.mubr.f32.gmra.mrb[4].mxu1 %v4564_v27  ;;  %3403 = vmatmul.mubr.f32.gmra.mrb[4].mxu0 %v4543_v15 }
  0x9e   : > { %3321 = vmatprep.mubr.f32.mxu1 %v4575_v37  ;;  %3405 = vmatprep.mubr.f32.mxu0 %v4559_v25  ;;  %v4321_v37 = vmov (!%p2964_p1), 0.0|0.0  }
  0x9f   : > { %3846 = vmatprep.subr.bf16.mxu0 (!%p2964_p1), %v4321_v37  ;;  %3918 = vmatprep.subr.bf16.mxu1 (!%p2964_p1), %v4321_v37 }
  0xa1   : > { %3322 = vmatmul.mubr.f32.gmra.mrb[6].mxu1 %v4580_v42  ;;  %3406 = vmatmul.mubr.f32.gmra.mrb[6].mxu0 %v4566_v28  ;;  %v4324_v42 = vmov (!%p2964_p1), 0  }
  0xa2   : > { %3424 = vmatprep.mubr.msk.f32.mxu0 (!%p2964_p1), %vm4322_vm4, %v4323_v40  ;;  %v1197_v46 = vsel (!%p2964_p1), %vm1195_vm3, 1.0, %v4324_v42  ;;  %3538 = vmatprep.mubr.msk.f32.mxu1 (!%p2964_p1), %vm4322_vm4, %v4323_v40 }
  0xa3   : > { %v4681_v49 = vsub.f32 (!%p2964_p1), %v1197_v46, %v1197_v46 }
  0xa5   : > { %v4778_v63 = vand.u32 (!%p2964_p1), 4294901760, %v4681_v49 }
 0x168   : > { %v3314_v32 = vpop.f32.mrb[0].mxu1  ;;  %v3398_v36 = vpop.f32.mrb[0].mxu0 }
 0x169   : > { %v4652_v41 = vadd.f32 %v3398_v36, %v3314_v32  ;;  %v697_v45 = vpop.f32.mrb[1].mxu1  ;;  %v1099_v48 = vpop.f32.mrb[1].mxu0 }
 0x16a   : > { %v4654_v55 = vadd.f32 %v1099_v48, %v697_v45 }
 0x16b   : > { %v1172_v4 = vsel (!%p2964_p1), %vm1164_vm7, %v4652_v41, 0.0  ;;  %v1188_v51 = vsel (!%p2964_p1), %vm1180_vm11, %v4652_v41, 0.0 }
 0x16c   : > { %v3317_v57 = vpop.f32.mrb[2].mxu1  ;;  %v3401_v58 = vpop.f32.mrb[2].mxu0  ;;  %v1171_v54 = vsel (!%p2964_p1), %vm1163_vm5, %v4654_v55, 0.0  ;;  %v1203_v43 = vand.u32 (!%p2964_p1), 4294901760, %v1172_v4  ;;  %v1187_v44 = vsel (!%p2964_p1), %vm1179_vm10, %v4654_v55, 0.0  ;;  %v1742_v20 = vand.u32 (!%p2964_p1), 4294901760, %v1188_v51 }
 0x16d   : > { %v4656_v62 = vadd.f32 %v3401_v58, %v3317_v57  ;;  %v711_v0 = vpop.f32.mrb[3].mxu1  ;;  %v1111_v1 = vpop.f32.mrb[3].mxu0  ;;  %v1200_v61 = vand.u32 (!%p2964_p1), 4294901760, %v1171_v54  ;;  %v1739_v19 = vand.u32 (!%p2964_p1), 4294901760, %v1187_v44 }
 0x16e   : > { %v4658_v2 = vadd.f32 %v1111_v1, %v711_v0  ;;  %v4711_v5 = vsub.f32 (!%p2964_p1), %v1172_v4, %v1203_v43  ;;  %v4720_v6 = vsub.f32 (!%p2964_p1), %v1188_v51, %v1742_v20 }
 0x16f   : > { %v4700_v50 = vsub.f32 (!%p2964_p1), %v1171_v54, %v1200_v61  ;;  %v1174_v11 = vsel (!%p2964_p1), %vm1166_vm9, %v4656_v62, 0.0  ;;  %v4709_v13 = vpack.c.bf16 (!%p2964_p1), %v1203_v43, %v1200_v61  ;;  %v4716_v23 = vpack.c.bf16 (!%p2964_p1), %v1742_v20, %v1739_v19 }
 0x170   : > { %v3320_v3 = vpop.f32.mrb[4].mxu1  ;;  %v3404_v12 = vpop.f32.mrb[4].mxu0  ;;  %1147 = sbr.rel (%p2964_p1) target bundleno = 682 (0x2aa), region = 32  ;;  %v1173_v10 = vsel (!%p2964_p1), %vm1165_vm8, %v4658_v2, 0.0  ;;  %v1209_v22 = vand.u32 (!%p2964_p1), 4294901760, %v1174_v11  ;;  %v4718_v24 = vsub.f32 (!%p2964_p1), %v1187_v44, %v1739_v19  ;;  %v1189_v26 = vsel (!%p2964_p1), %vm1181_vm12, %v4658_v2, 0.0 }
 0x171   : > { %v4660_v14 = vadd.f32 %v3404_v12, %v3320_v3  ;;  %v725_v15 = vpop.f32.mrb[5].mxu1  ;;  %v1123_v16 = vpop.f32.mrb[5].mxu0  ;;  %v1206_v21 = vand.u32 (!%p2964_p1), 4294901760, %v1173_v10  ;;  %3848 = vmatpush3.bf16.msra.mxu0 (!%p2964_p1), %v4709_v13  ;;  %v1190_v47 = vsel (!%p2964_p1), %vm1182_vm13, %v4656_v62, 0.0  ;;  %3920 = vmatpush3.bf16.msra.mxu1 (!%p2964_p1), %v4716_v23  ;;  %v1745_v31 = vand.u32 (!%p2964_p1), 4294901760, %v1189_v26 }
 0x172   : > { %v4662_v17 = vadd.f32 %v1123_v16, %v725_v15  ;;  %3849 = vmatprep.subr.bf16.mxu0 (!%p2964_p1), %v4321_v37  ;;  %v4728_v30 = vsub.f32 (!%p2964_p1), %v1174_v11, %v1209_v22  ;;  %v1748_v32 = vand.u32 (!%p2964_p1), 4294901760, %v1190_v47  ;;  %3921 = vmatprep.subr.bf16.mxu1 (!%p2964_p1), %v4321_v37  ;;  %v1155_v15 = vadd.s32 (!%p2964_p1), 48, %v4672_v38 }
 0x173   : > { %v4724_v7 = vpack.c.bf16 (!%p2964_p1), %v1209_v22, %v1206_v21  ;;  %v4726_v29 = vsub.f32 (!%p2964_p1), %v1173_v10, %v1206_v21  ;;  %v1176_v45 = vsel (!%p2964_p1), %vm1168_vm15, %v4660_v14, 0.0  ;;  %v4742_v57 = vsub.f32 (!%p2964_p1), %v1189_v26, %v1745_v31 }
 0x174   : > { %v3323_v18 = vpop.f32.mrb[6].mxu1  ;;  %v3407_v25 = vpop.f32.mrb[6].mxu0  ;;  %v1175_v36 = vsel (!%p2964_p1), %vm1167_vm14, %v4662_v17, 0.0  ;;  %v4740_v48 = vpack.c.bf16 (!%p2964_p1), %v1748_v32, %v1745_v31  ;;  %v4744_v58 = vsub.f32 (!%p2964_p1), %v1190_v47, %v1748_v32  ;;  %v1215_v1 = vand.u32 (!%p2964_p1), 4294901760, %v1176_v45 }
 0x175   : > { %v4664_v27 = vadd.f32 %v3407_v25, %v3323_v18  ;;  %v739_v28 = vpop.f32.mrb[7].mxu1  ;;  %v1135_v33 = vpop.f32.mrb[7].mxu0  ;;  %3851 = vmatpush3.bf16.msra.mxu0 (!%p2964_p1), %v4724_v7  ;;  %v1212_v0 = vand.u32 (!%p2964_p1), 4294901760, %v1175_v36  ;;  %v1191_v3 = vsel (!%p2964_p1), %vm1183_vm0, %v4662_v17, 0.0  ;;  %v1192_v12 = vsel (!%p2964_p1), %vm1184_vm1, %v4660_v14, 0.0 }
 0x176   : > { %v4666_v34 = vadd.f32 %v1135_v33, %v739_v28  ;;  %3852 = vmatprep.subr.bf16.mxu0 (!%p2964_p1), %v4321_v37  ;;  %3923 = vmatpush3.bf16.msra.mxu1 (!%p2964_p1), %v4740_v48  ;;  %v1751_v18 = vand.u32 (!%p2964_p1), 4294901760, %v1191_v3  ;;  %v1754_v25 = vand.u32 (!%p2964_p1), 4294901760, %v1192_v12  ;;  %v1156_v28 = vadd.s32 (!%p2964_p1), 56, %v4672_v38 }
 0x177   : > { %v4751_v16 = vsub.f32 %v1175_v36, %v1212_v0  ;;  %v4754_v33 = vpack.c.bf16 %v1215_v1, %v1212_v0  ;;  %v4756_v35 = vsub.f32 %v1176_v45, %v1215_v1  ;;  %3924 = vmatprep.subr.bf16.mxu1 %v4321_v37  ;;  %vm1169_vm2 = vcmp.eq.s32.totalorder %v1155_v15, %v4674_v39 }
 0x178   : > { %vm1185_vm5 = vcmp.eq.s32.totalorder %v1155_v15, %v4696_v9  ;;  %v4761_v42 = vpack.c.bf16 %v1754_v25, %v1751_v18  ;;  %v4763_v46 = vsub.f32 %v1191_v3, %v1751_v18  ;;  %v4765_v52 = vsub.f32 %v1192_v12, %v1754_v25 }
 0x179   : > { %vm1170_vm6 = vcmp.eq.s32.totalorder %v1156_v28, %v4674_v39  ;;  %3854 = vmatpush3.bf16.msra.mxu0 %v4754_v33  ;;  %v1177_v38 = vsel %vm1169_vm2, %v4666_v34, 0.0  ;;  %vm1186_vm7 = vcmp.eq.s32.totalorder %v1156_v28, %v4696_v9  ;;  %v1193_v54 = vsel %vm1185_vm5, %v4666_v34, 0.0 }
 0x17a   : > { %v1178_v53 = vsel %vm1170_vm6, %v4664_v27, 0.0  ;;  %3926 = vmatpush3.bf16.msra.mxu1 %v4761_v42  ;;  %3855 = vmatprep.subr.bf16.mxu0 %v4321_v37  ;;  %v1218_v56 = vand.u32 4294901760, %v1177_v38  ;;  %v1194_v60 = vsel %vm1186_vm7, %v4664_v27, 0.0  ;;  %v1757_v61 = vand.u32 4294901760, %v1193_v54 }
 0x17b   : > { %v1221_v59 = vand.u32 4294901760, %v1178_v53  ;;  %3927 = vmatprep.subr.bf16.mxu1 %v4321_v37  ;;  %v1760_v39 = vand.u32 4294901760, %v1194_v60  ;;  %v1285_v8 = vand.u32 4294901760, %v4700_v50  ;;  %v1292_v4 = vand.u32 4294901760, %v4711_v5 }
 0x17c   : > { %v4784_v43 = vsub.f32 %v1177_v38, %v1218_v56  ;;  %v4788_v51 = vsub.f32 %v1193_v54, %v1757_v61  ;;  %v1275_v19 = vsub.f32 %v4681_v49, %v4778_v63  ;;  %v1824_v22 = vand.u32 4294901760, %v4718_v24 }
 0x17d   : > { %v4782_v9 = vpack.c.bf16 %v1221_v59, %v1218_v56  ;;  %v4786_v44 = vsub.f32 %v1178_v53, %v1221_v59  ;;  %v4790_v10 = vpack.c.bf16 %v1760_v39, %v1757_v61  ;;  %v4792_v11 = vsub.f32 %v1194_v60, %v1760_v39 }
 0x17e   : > { %v1286_v20 = vsub.f32 %v4700_v50, %v1285_v8  ;;  %v1293_v21 = vsub.f32 %v4711_v5, %v1292_v4  ;;  %v1831_v26 = vand.u32 4294901760, %v4720_v6  ;;  %v1299_v47 = vand.u32 4294901760, %v4726_v29 }
 0x17f   : > { %3857 = vmatpush3.bf16.msra.mxu0 %v4782_v9  ;;  %3929 = vmatpush3.bf16.msra.mxu1 %v4790_v10  ;;  %v1276_v31 = vand.u32 4294901760, %v1275_v19  ;;  %v1306_v36 = vand.u32 4294901760, %v4728_v30  ;;  %v1838_v45 = vand.u32 4294901760, %v4742_v57  ;;  %v1825_v1 = vsub.f32 %v4718_v24, %v1824_v22 }
 0x180   : > { %3858 = vmatprep.subr.bf16.mxu0 %v4321_v37  ;;  %v1287_v32 = vand.u32 4294901760, %v1286_v20  ;;  %v1294_v0 = vand.u32 4294901760, %v1293_v21  ;;  %3930 = vmatprep.subr.bf16.mxu1 %v4321_v37  ;;  %v1832_v3 = vsub.f32 %v4720_v6, %v1831_v26  ;;  %v1300_v12 = vsub.f32 %v4726_v29, %v1299_v47 }
 0x181   : > { %v1307_v15 = vsub.f32 %v4728_v30, %v1306_v36  ;;  %v1839_v18 = vsub.f32 %v4742_v57, %v1838_v45  ;;  %v1845_v25 = vand.u32 4294901760, %v4744_v58  ;;  %v1313_v28 = vand.u32 4294901760, %v4751_v16 }
 0x182   : > { %3425 = vmatmul.mubr.f32.vlgmr.msra.gmra.mrb[0].mxu0 %v1276_v31  ;;  %v3859_v38 = vpack.c.bf16 %v1294_v0, %v1287_v32  ;;  %3539 = vmatmul.mubr.f32.vlgmr.msra.gmra.mrb[0].mxu1 %v1276_v31  ;;  %v1826_v53 = vand.u32 4294901760, %v1825_v1  ;;  %v1833_v54 = vand.u32 4294901760, %v1832_v3  ;;  %v1301_v56 = vand.u32 4294901760, %v1300_v12 }
 0x183   : > { %3443 = vmatprep.mubr.msk.f32.mxu0 %vm4322_vm4, %v4323_v40  ;;  %v1308_v59 = vand.u32 4294901760, %v1307_v15  ;;  %v1840_v60 = vand.u32 4294901760, %v1839_v18  ;;  %v1846_v61 = vsub.f32 %v4744_v58, %v1845_v25  ;;  %v1314_v39 = vsub.f32 %v4751_v16, %v1313_v28  ;;  %3557 = vmatprep.mubr.msk.f32.mxu1 %vm4322_vm4, %v4323_v40 }
 0x184   : > { %3860 = vmatpush3.bf16.msra.mxu0 %v3859_v38  ;;  %v3931_v19 = vpack.c.bf16 %v1833_v54, %v1826_v53  ;;  %v1320_v20 = vand.u32 4294901760, %v4756_v35  ;;  %v5206_v21 = vand.u32 4294901760, %v4763_v46  ;;  %v5205_v31 = vand.u32 4294901760, %v4765_v52 }
 0x185   : > { %3861 = vmatprep.subr.bf16.mxu0 %v4321_v37  ;;  %v3862_v32 = vpack.c.bf16 %v1308_v59, %v1301_v56  ;;  %v1847_v0 = vand.u32 4294901760, %v1846_v61  ;;  %v1315_v1 = vand.u32 4294901760, %v1314_v39  ;;  %v5207_v3 = vand.u32 4294901760, %v4784_v43 }
 0x186   : > { %3932 = vmatpush3.bf16.msra.mxu1 %v3931_v19  ;;  %v1321_v12 = vsub.f32 %v4756_v35, %v1320_v20  ;;  %v1853_v15 = vsub.f32 %v4763_v46, %v5206_v21  ;;  %v1860_v18 = vsub.f32 %v4765_v52, %v5205_v31  ;;  %v5208_v38 = vand.u32 4294901760, %v4786_v44 }
 0x187   : > { %3933 = vmatprep.subr.bf16.mxu1 %v4321_v37  ;;  %v3934_v53 = vpack.c.bf16 %v1847_v0, %v1840_v60  ;;  %v1328_v54 = vsub.f32 %v4784_v43, %v5207_v3  ;;  %v1866_v56 = vand.u32 4294901760, %v4788_v51  ;;  %v5209_v59 = vand.u32 4294901760, %v4792_v11 }
 0x188   : > { %3863 = vmatpush3.bf16.msra.mxu0 %v3862_v32  ;;  %v1322_v61 = vand.u32 4294901760, %v1321_v12  ;;  %v1854_v39 = vand.u32 4294901760, %v1853_v15  ;;  %v1861_v19 = vand.u32 4294901760, %v1860_v18  ;;  %v1335_v31 = vsub.f32 %v4786_v44, %v5208_v38 }
 0x189   : > { %3864 = vmatprep.subr.bf16.mxu0 %v4321_v37  ;;  %v1329_v21 = vand.u32 4294901760, %v1328_v54  ;;  %v1867_v60 = vsub.f32 %v4788_v51, %v1866_v56  ;;  %v1874_v0 = vsub.f32 %v4792_v11, %v5209_v59  ;;  %v3871_v59 = vpack.c.bf16 %v4711_v5, %v4700_v50 }
 0x18a   : > { %3935 = vmatpush3.bf16.msra.mxu1 %v3934_v53  ;;  %v3865_v32 = vpack.c.bf16 %v1322_v61, %v1315_v1  ;;  %v3937_v12 = vpack.c.bf16 %v1861_v19, %v1854_v39  ;;  %v1336_v15 = vand.u32 4294901760, %v1335_v31  ;;  %v3943_v31 = vpack.c.bf16 %v4720_v6, %v4718_v24 }
 0x18b   : > { %3936 = vmatprep.subr.bf16.mxu1 %v4321_v37  ;;  %v1868_v18 = vand.u32 4294901760, %v1867_v60  ;;  %v1875_v3 = vand.u32 4294901760, %v1874_v0  ;;  %v4325_v1 = vmov 1.0   ;;  %v3949_v53 = vpack.c.bf16 %v4765_v52, %v4763_v46 }
 0x18c   : > { %3866 = vmatpush3.bf16.msra.mxu0 %v3865_v32  ;;  %v3868_v38 = vpack.c.bf16 %v1336_v15, %v1329_v21  ;;  %v3874_v21 = vpack.c.bf16 %v4728_v30, %v4726_v29  ;;  %v3952_v61 = vpack.c.bf16 %v4792_v11, %v4788_v51  ;;  %v3967_v39 = vpack.c.bf16 %v1831_v26, %v1824_v22 }
 0x18d   : > { %3867 = vmatprep.subr.bf16.mxu0 %v4321_v37  ;;  %v3940_v54 = vpack.c.bf16 %v1875_v3, %v1868_v18  ;;  %v3946_v3 = vpack.c.bf16 %v4744_v58, %v4742_v57  ;;  %v3898_v50 = vpack.c.bf16 %v1306_v36, %v1299_v47  ;;  %v3970_v5 = vpack.c.bf16 %v1845_v25, %v1838_v45 }
 0x18e   : > { %3938 = vmatpush3.bf16.msra.mxu1 %v3937_v12  ;;  %v3901_v24 = vpack.c.bf16 %v1320_v20, %v1313_v28  ;;  %v5212_v6 = vand.u32 4294901760, %v4763_v46  ;;  %v5213_v29 = vand.u32 4294901760, %v4765_v52  ;;  %v5214_v57 = vand.u32 4294901760, %v4784_v43 }
 0x18f   : > { %3939 = vmatprep.subr.bf16.mxu1 %v4321_v37  ;;  %v5215_v58 = vand.u32 4294901760, %v4786_v44 }
 0x190   : > { %3869 = vmatpush3.bf16.msra.mxu0 %v3868_v38  ;;  %v3877_v38 = vpack.c.bf16 %v4756_v35, %v4751_v16  ;;  %v3973_v30 = vpack.c.bf16 %v5213_v29, %v5212_v6  ;;  %v5216_v16 = vand.u32 4294901760, %v4792_v11 }
 0x191   : > { %3870 = vmatprep.subr.bf16.mxu0 %v4321_v37 }
 0x192   : > { %3941 = vmatpush3.bf16.msra.mxu1 %v3940_v54  ;;  %v3976_v35 = vpack.c.bf16 %v5216_v16, %v1866_v56 }
 0x193   : > { %3444 = vmatmul.mubr.msk.f32.vlgmr.msra.gmra.mrb[0].mxu0 %vm1195_vm3, %v4325_v1  ;;  %3942 = vmatprep.subr.bf16.mxu1 %v4321_v37 }
 0x194   : > { %3872 = vmatpush3.bf16.msra.mxu0 %v3871_v59  ;;  %3462 = vmatprep.mubr.msk.f32.mxu0 %vm4322_vm4, %v4323_v40  ;;  %v3880_v59 = vpack.c.bf16 %v4786_v44, %v4784_v43 }
 0x195   : > { %3558 = vmatmul.mubr.msk.f32.vlgmr.msra.gmra.mrb[0].mxu1 %vm1195_vm3, %v4325_v1  ;;  %3873 = vmatprep.subr.bf16.mxu0 %v4321_v37 }
 0x196   : > { %3944 = vmatpush3.bf16.msra.mxu1 %v3943_v31  ;;  %3576 = vmatprep.mubr.msk.f32.mxu1 %vm4322_vm4, %v4323_v40 }
 0x197   : > { %3945 = vmatprep.subr.bf16.mxu1 %v4321_v37 }
 0x198   : > { %3875 = vmatpush3.bf16.msra.mxu0 %v3874_v21 }
 0x199   : > { %3876 = vmatprep.subr.bf16.mxu0 %v4321_v37 }
 0x19a   : > { %3947 = vmatpush3.bf16.msra.mxu1 %v3946_v3 }
 0x19b   : > { %3948 = vmatprep.subr.bf16.mxu1 %v4321_v37 }
 0x19c   : > { %3878 = vmatpush3.bf16.msra.mxu0 %v3877_v38 }
 0x19d   : > { %3879 = vmatprep.subr.bf16.mxu0 %v4321_v37 }
 0x19e   : > { %3950 = vmatpush3.bf16.msra.mxu1 %v3949_v53 }
 0x19f   : > { %3951 = vmatprep.subr.bf16.mxu1 %v4321_v37 }
 0x1a0   : > { %3881 = vmatpush3.bf16.msra.mxu0 %v3880_v59 }
 0x1a1   : > { %3882 = vmatprep.subr.bf16.mxu0 %v4321_v37 }
 0x1a2   : > { %3953 = vmatpush3.bf16.msra.mxu1 %v3952_v61 }
 0x1a3   : > { %3463 = vmatmul.mubr.f32.vlgmr.msra.gmra.mrb[0].mxu0 %v4681_v49  ;;  %3954 = vmatprep.subr.bf16.mxu1 %v4321_v37 }
 0x1a4   : > { %3884 = vmatpush3.bf16.msra.mxu0 %v4709_v13  ;;  %3481 = vmatprep.mubr.msk.f32.mxu0 %vm4322_vm4, %v4323_v40 }
 0x1a5   : > { %3577 = vmatmul.mubr.f32.vlgmr.msra.gmra.mrb[0].mxu1 %v4681_v49  ;;  %3885 = vmatprep.subr.bf16.mxu0 %v4321_v37  ;;  %v3895_v49 = vpack.c.bf16 %v1292_v4, %v1285_v8 }
 0x1a6   : > { %3956 = vmatpush3.bf16.msra.mxu1 %v4716_v23  ;;  %3595 = vmatprep.mubr.msk.f32.mxu1 %vm4322_vm4, %v4323_v40 }
 0x1a7   : > { %3957 = vmatprep.subr.bf16.mxu1 %v4321_v37 }
 0x1a8   : > { %3887 = vmatpush3.bf16.msra.mxu0 %v4724_v7 }
 0x1a9   : > { %3888 = vmatprep.subr.bf16.mxu0 %v4321_v37 }
 0x1aa   : > { %3959 = vmatpush3.bf16.msra.mxu1 %v4740_v48 }
 0x1ab   : > { %3960 = vmatprep.subr.bf16.mxu1 %v4321_v37 }
 0x1ac   : > { %3890 = vmatpush3.bf16.msra.mxu0 %v4754_v33 }
 0x1ad   : > { %3891 = vmatprep.subr.bf16.mxu0 %v4321_v37 }
 0x1ae   : > { %3962 = vmatpush3.bf16.msra.mxu1 %v4761_v42 }
 0x1af   : > { %3963 = vmatprep.subr.bf16.mxu1 %v4321_v37 }
 0x1b0   : > { %3893 = vmatpush3.bf16.msra.mxu0 %v4782_v9 }
 0x1b1   : > { %3894 = vmatprep.subr.bf16.mxu0 %v4321_v37 }
 0x1b2   : > { %3965 = vmatpush3.bf16.msra.mxu1 %v4790_v10 }
 0x1b3   : > { %3482 = vmatmul.mubr.f32.vlgmr.msra.gmra.mrb[0].mxu0 %v4778_v63  ;;  %3966 = vmatprep.subr.bf16.mxu1 %v4321_v37 }
 0x1b4   : > { %3896 = vmatpush3.bf16.msra.mxu0 %v3895_v49  ;;  %3500 = vmatprep.mubr.msk.f32.mxu0 %vm4322_vm4, %v4323_v40 }
 0x1b5   : > { %3596 = vmatmul.mubr.f32.vlgmr.msra.gmra.mrb[0].mxu1 %v4778_v63  ;;  %3897 = vmatprep.subr.bf16.mxu0 %v4321_v37  ;;  %v3904_v63 = vpack.c.bf16 %v5215_v58, %v5214_v57 }
 0x1b6   : > { %3968 = vmatpush3.bf16.msra.mxu1 %v3967_v39  ;;  %3614 = vmatprep.mubr.msk.f32.mxu1 %vm4322_vm4, %v4323_v40 }
 0x1b7   : > { %3969 = vmatprep.subr.bf16.mxu1 %v4321_v37 }
 0x1b8   : > { %3899 = vmatpush3.bf16.msra.mxu0 %v3898_v50 }
 0x1b9   : > { %3900 = vmatprep.subr.bf16.mxu0 %v4321_v37 }
 0x1ba   : > { %3971 = vmatpush3.bf16.msra.mxu1 %v3970_v5 }
 0x1bb   : > { %3972 = vmatprep.subr.bf16.mxu1 %v4321_v37 }
 0x1bc   : > { %3902 = vmatpush3.bf16.msra.mxu0 %v3901_v24 }
 0x1bd   : > { %3903 = vmatprep.subr.bf16.mxu0 %v4321_v37 }
 0x1be   : > { %3974 = vmatpush3.bf16.msra.mxu1 %v3973_v30 }
 0x1bf   : > { %3975 = vmatprep.subr.bf16.mxu1 %v4321_v37 }
 0x1c0   : > { %3905 = vmatpush3.bf16.msra.mxu0 %v3904_v63 }
 0x1c1   : > { %3906 = vmatprep.subr.bf16.mxu0 %v4321_v37 }
 0x1c2   : > { %3977 = vmatpush3.bf16.msra.mxu1 %v3976_v35 }
 0x1c3   : > { %3501 = vmatmul.mubr.msk.f32.vlgmr.msra.gmra.mrb[0].mxu0 %vm1195_vm3, %v4325_v1  ;;  %3978 = vmatprep.subr.bf16.mxu1 %v4321_v37 }
 0x1c4   : > { %3908 = vmatpush3.bf16.msra.mxu0 %v4709_v13  ;;  %3519 = vmatprep.mubr.msk.f32.mxu0 %vm4322_vm4, %v4323_v40 }
 0x1c5   : > { %3615 = vmatmul.mubr.msk.f32.vlgmr.msra.gmra.mrb[0].mxu1 %vm1195_vm3, %v4325_v1  ;;  %3909 = vmatprep.subr.bf16.mxu0 %v4321_v37 }
 0x1c6   : > { %3980 = vmatpush3.bf16.msra.mxu1 %v4716_v23  ;;  %3633 = vmatprep.mubr.msk.f32.mxu1 %vm4322_vm4, %v4323_v40  ;;  %vm1736_vm4 = vcmask 516096  }
 0x1c7   : > { %3981 = vmatprep.subr.bf16.mxu1 %v4321_v37 }
 0x1c8   : > { %3911 = vmatpush3.bf16.msra.mxu0 %v4724_v7 }
 0x1c9   : > { %3912 = vmatprep.subr.bf16.mxu0 %v4321_v37 }
 0x1ca   : > { %3983 = vmatpush3.bf16.msra.mxu1 %v4740_v48 }
 0x1cb   : > { %3984 = vmatprep.subr.bf16.mxu1 %v4321_v37 }
 0x1cc   : > { %3914 = vmatpush3.bf16.msra.mxu0 %v4754_v33 }
 0x1cd   : > { %3915 = vmatprep.subr.bf16.mxu0 %v4321_v37 }
 0x1ce   : > { %3986 = vmatpush3.bf16.msra.mxu1 %v4761_v42 }
 0x1cf   : > { %3987 = vmatprep.subr.bf16.mxu1 %v4321_v37 }
 0x1d0   : > { %3917 = vmatpush3.bf16.msra.mxu0 %v4782_v9 }
 0x1d2   : > { %3989 = vmatpush3.bf16.msra.mxu1 %v4790_v10 }
 0x1d3   : > { %3520 = vmatmul.mubr.msk.f32.vlgmr.msra.gmra.mrb[0].mxu0 %vm1195_vm3, %v4325_v1 }
 0x1d5   : > { %3634 = vmatmul.mubr.msk.f32.vlgmr.msra.gmra.mrb[0].mxu1 %vm1195_vm3, %v4325_v1 }
 0x2a6   : > { %v1732_v40 = vpop.f32.mrb[0].mxu0 }
 0x2a7   : > { %1737 = vst.msk [vmem:[#allocation4] sm:$0x1] %vm1736_vm4, %v1732_v40  ;;  %v3521_v13 = vpop.f32.mrb[1].mxu0 }
 0x2a8   : > { %v2271_v23 = vpop.f32.mrb[0].mxu1 }
 0x2a9   : > { %2275 = vst.msk [vmem:[#allocation3] sm:$0x1] %vm1736_vm4, %v2271_v23  ;;  %v3635_v7 = vpop.f32.mrb[1].mxu1 }
 0x2aa PF: > { %v4326_v37 = vmov 0.0|0.0   ;;  %vm4327_vm3 = vmmov 0   ;;  %v4328_v10 = vmov 0.0   ;;  %vm2308_vm8 = vcmask 523264   ;;  %p2977_p2 = scmp.ne.s32.totalorder %s4302_s9, 1 }
 0x2ab   : > { %3990 = vmatprep.subr.bf16.mxu0 %v4326_v37  ;;  %4002 = vmatprep.subr.bf16.mxu1 %v4326_v37  ;;  %v4329_v26 = vmov 0   ;;  %vm2850_vm9 = vcmask 516096  }
 0x2ac   : > { %3652 = vmatprep.mubr.msk.f32.mxu0 %vm4327_vm3, %v4328_v10  ;;  %3671 = vmatprep.mubr.msk.f32.mxu1 %vm4327_vm3, %v4328_v10  ;;  %v2310_v47 = vsel %vm2308_vm8, 1.0, %v4329_v26  ;;  %v4330_v26 = vmov 1.0  }
 0x2ad   : > { %v5021_v0 = vsub.f32 %v2310_v47, %v2310_v47 }
 0x2ae   : > { %v2973_v48 = vld [vmem:[#allocation4] ss:$0 sm:$0xff] }
 0x2af   : > { %v2283_v33 = vsub.f32 %v4654_v55, %v2973_v48  ;;  %v2284_v42 = vsub.f32 %v4652_v41, %v2973_v48  ;;  %v2285_v46 = vsub.f32 %v4658_v2, %v2973_v48  ;;  %v2286_v52 = vsub.f32 %v4656_v62, %v2973_v48 }
 0x2b0   : > { %v2287_v8 = vsub.f32 %v4662_v17, %v2973_v48  ;;  %v2288_v4 = vsub.f32 %v4660_v14, %v2973_v48  ;;  %v2289_v51 = vsub.f32 %v4666_v34, %v2973_v48  ;;  %v2290_v55 = vsub.f32 %v4664_v27, %v2973_v48 }
 0x2b1   : > { %v2291_v9 = vmul.f32 1.442695, %v2283_v33  ;;  %v2293_v43 = vmul.f32 1.442695, %v2284_v42  ;;  %v2295_v44 = vmul.f32 1.442695, %v2285_v46 }
 0x2b2   : > { %v2297_v41 = vmul.f32 1.442695, %v2286_v52  ;;  %v2299_v62 = vmul.f32 1.442695, %v2287_v8  ;;  %v2301_v2 = vmul.f32 1.442695, %v2288_v4 }
 0x2b3   : > { %4204 = vpow2.f32 %v2291_v9  ;;  %v2303_v14 = vmul.f32 1.442695, %v2289_v51  ;;  %v2305_v17 = vmul.f32 1.442695, %v2290_v55  ;;  %v2387_v24 = vand.u32 4294901760, %v5021_v0 }
 0x2b4   : > { %4206 = vpow2.f32 %v2293_v43 }
 0x2b5   : > { %4208 = vpow2.f32 %v2295_v44  ;;  %v2388_v52 = vsub.f32 %v5021_v0, %v2387_v24 }
 0x2b6   : > { %4210 = vpow2.f32 %v2297_v41 }
 0x2b7   : > { %4212 = vpow2.f32 %v2299_v62  ;;  %v2389_v55 = vand.u32 4294901760, %v2388_v52 }
 0x2b8   : > { %4214 = vpow2.f32 %v2301_v2 }
 0x2b9   : > { %4216 = vpow2.f32 %v2303_v14 }
 0x2ba   : > { %4218 = vpow2.f32 %v2305_v17 }
 0x2bd   : > { %v4205_v34 = vpop.eup %4204 }
 0x2be   : > { %v4207_v11 = vpop.eup %4206  ;;  %v2313_v22 = vand.u32 4294901760, %v4205_v34 }
 0x2bf   : > { %v4209_v27 = vpop.eup %4208  ;;  %v2316_v36 = vand.u32 4294901760, %v4207_v11 }
 0x2c0   : > { %v4211_v45 = vpop.eup %4210  ;;  %v5015_v25 = vsub.f32 %v4205_v34, %v2313_v22  ;;  %v2319_v28 = vand.u32 4294901760, %v4209_v27 }
 0x2c1   : > { %v4213_v20 = vpop.eup %4212  ;;  %v5017_v56 = vpack.c.bf16 %v2316_v36, %v2313_v22  ;;  %v5019_v19 = vsub.f32 %v4207_v11, %v2316_v36  ;;  %v2322_v60 = vand.u32 4294901760, %v4211_v45 }
 0x2c2   : > { %v4215_v32 = vpop.eup %4214  ;;  %v5023_v12 = vsub.f32 %v4209_v27, %v2319_v28  ;;  %v2325_v15 = vand.u32 4294901760, %v4213_v20  ;;  %v2398_v18 = vand.u32 4294901760, %v5015_v25 }
 0x2c3   : > { %v4217_v54 = vpop.eup %4216  ;;  %3992 = vmatpush3.bf16.msra.mxu0 %v5017_v56  ;;  %v5027_v31 = vpack.c.bf16 %v2322_v60, %v2319_v28  ;;  %v5029_v1 = vsub.f32 %v4211_v45, %v2322_v60  ;;  %v2328_v21 = vand.u32 4294901760, %v4215_v32  ;;  %v2405_v3 = vand.u32 4294901760, %v5019_v19 }
 0x2c4   : > { %v4219_v38 = vpop.eup %4218  ;;  %3993 = vmatprep.subr.bf16.mxu0 %v4326_v37  ;;  %v5033_v53 = vsub.f32 %v4213_v20, %v2325_v15  ;;  %v2399_v59 = vsub.f32 %v5015_v25, %v2398_v18  ;;  %v2331_v61 = vand.u32 4294901760, %v4217_v54  ;;  %v2412_v49 = vand.u32 4294901760, %v5023_v12 }
 0x2c5   : > { %v5039_v39 = vsub.f32 %v4215_v32, %v2328_v21  ;;  %v2406_v50 = vsub.f32 %v5019_v19, %v2405_v3  ;;  %v2334_v5 = vand.u32 4294901760, %v4219_v38  ;;  %v2419_v57 = vand.u32 4294901760, %v5029_v1 }
 0x2c6   : > { %v2400_v6 = vand.u32 4294901760, %v2399_v59  ;;  %v5045_v29 = vsub.f32 %v4217_v54, %v2331_v61  ;;  %v2413_v30 = vsub.f32 %v5023_v12, %v2412_v49  ;;  %v5052_v58 = vpack.c.bf16 %v2328_v21, %v2325_v15  ;;  %v2307_v21 = vld [vmem:[#allocation5] sm:$0x1]  ;;  %v2856_v59 = vld [vmem:[#allocation4] sm:$0x1] (!%p2977_p2) }
 0x2c7   : > { %3995 = vmatpush3.bf16.msra.mxu0 %v5027_v31  ;;  %v2407_v63 = vand.u32 4294901760, %v2406_v50  ;;  %v5054_v16 = vsub.f32 %v4219_v38, %v2334_v5  ;;  %v2426_v35 = vand.u32 4294901760, %v5033_v53  ;;  %v2420_v13 = vsub.f32 %v5029_v1, %v2419_v57 }
 0x2c8   : > { %3996 = vmatprep.subr.bf16.mxu0 %v4326_v37  ;;  %v2414_v40 = vand.u32 4294901760, %v2413_v30  ;;  %v2433_v23 = vand.u32 4294901760, %v5039_v39  ;;  %v2440_v33 = vand.u32 4294901760, %v5045_v29  ;;  %v5072_v4 = vpack.c.bf16 %v2334_v5, %v2331_v61  ;;  %v2857_v61 = vld [vmem:[#allocation3] sm:$0x1] (!%p2977_p2) }
 0x2c9   : > { %v4003_v7 = vpack.c.bf16 %v2407_v63, %v2400_v6  ;;  %v2427_v48 = vsub.f32 %v5033_v53, %v2426_v35  ;;  %v2447_v42 = vand.u32 4294901760, %v5054_v16  ;;  %v2421_v46 = vand.u32 4294901760, %v2420_v13 }
 0x2ca   : > { %v2434_v8 = vsub.f32 %v5039_v39, %v2433_v23  ;;  %v2441_v43 = vsub.f32 %v5045_v29, %v2440_v33  ;;  %v4015_v2 = vpack.c.bf16 %v5019_v19, %v5015_v25  ;;  %v4018_v11 = vpack.c.bf16 %v5029_v1, %v5023_v12 }
 0x2cb   : > { %3998 = vmatpush3.bf16.msra.mxu0 %v5052_v58  ;;  %4004 = vmatpush3.bf16.msra.mxu1 %v4003_v7  ;;  %v2428_v9 = vand.u32 4294901760, %v2427_v48  ;;  %v2448_v44 = vsub.f32 %v5054_v16, %v2447_v42  ;;  %v4006_v51 = vpack.c.bf16 %v2421_v46, %v2414_v40  ;;  %v4021_v22 = vpack.c.bf16 %v5039_v39, %v5033_v53 }
 0x2cc   : > { %3999 = vmatprep.subr.bf16.mxu0 %v4326_v37  ;;  %4005 = vmatprep.subr.bf16.mxu1 %v4326_v37  ;;  %v2435_v41 = vand.u32 4294901760, %v2434_v8  ;;  %v2442_v14 = vand.u32 4294901760, %v2441_v43  ;;  %v4024_v47 = vpack.c.bf16 %v5054_v16, %v5045_v29  ;;  %v4039_v27 = vpack.c.bf16 %v2405_v3, %v2398_v18 }
 0x2cd   : > { %v2449_v17 = vand.u32 4294901760, %v2448_v44  ;;  %v4042_v36 = vpack.c.bf16 %v2419_v57, %v2412_v49  ;;  %v4045_v45 = vpack.c.bf16 %v2433_v23, %v2426_v35  ;;  %v4048_v25 = vpack.c.bf16 %v2447_v42, %v2440_v33 }
 0x2ce   : > { %v4009_v62 = vpack.c.bf16 %v2435_v41, %v2428_v9  ;;  %v2859_v49 = vsub.f32 (!%p2977_p2), %v2857_v61, %v2856_v59 }
 0x2cf   : > { %4001 = vmatpush3.bf16.msra.mxu0 %v5072_v4  ;;  %4007 = vmatpush3.bf16.msra.mxu1 %v4006_v51  ;;  %v4012_v34 = vpack.c.bf16 %v2449_v17, %v2442_v14 }
 0x2d0   : > { %4008 = vmatprep.subr.bf16.mxu1 %v4326_v37  ;;  %4014 = vmatprep.subr.bf16.mxu0 %v4326_v37  ;;  %v2860_v39 = vmul.f32 (!%p2977_p2), 1.442695, %v2859_v49 }
 0x2d2   : > { %3653 = vmatmul.mubr.f32.vlgmr.msra.gmra.mrb[0].mxu0 %v2389_v55  ;;  %4220 = vpow2.f32 (!%p2977_p2), %v2860_v39 }
 0x2d3   : > { %4010 = vmatpush3.bf16.msra.mxu1 %v4009_v62  ;;  %4016 = vmatpush3.bf16.msra.mxu0 %v4015_v2 }
 0x2d4   : > { %4011 = vmatprep.subr.bf16.mxu1 %v4326_v37  ;;  %4017 = vmatprep.subr.bf16.mxu0 %v4326_v37 }
 0x2d5   : > { %3690 = vmatprep.mubr.msk.f32.mxu0 %vm4327_vm3, %v4328_v10 }
 0x2d7   : > { %4013 = vmatpush3.bf16.msra.mxu1 %v4012_v34  ;;  %4019 = vmatpush3.bf16.msra.mxu0 %v4018_v11 }
 0x2d8   : > { %4020 = vmatprep.subr.bf16.mxu0 %v4326_v37  ;;  %4026 = vmatprep.subr.bf16.mxu1 %v4326_v37 }
 0x2da   : > { %3672 = vmatmul.mubr.msk.f32.vlgmr.msra.gmra.mrb[0].mxu1 %vm2308_vm8, %v4330_v26 }
 0x2db   : > { %4022 = vmatpush3.bf16.msra.mxu0 %v4021_v22  ;;  %4028 = vmatpush3.bf16.msra.mxu1 %v5017_v56 }
 0x2dc   : > { %4023 = vmatprep.subr.bf16.mxu0 %v4326_v37  ;;  %4029 = vmatprep.subr.bf16.mxu1 %v4326_v37  ;;  %v4221_v5 = vpop.eup (!%p2977_p2), %4220 }
 0x2dd   : > { %3709 = vmatprep.mubr.msk.f32.mxu1 %vm4327_vm3, %v4328_v10 }
 0x2df   : > { %4025 = vmatpush3.bf16.msra.mxu0 %v4024_v47  ;;  %4031 = vmatpush3.bf16.msra.mxu1 %v5027_v31 }
 0x2e0   : > { %4032 = vmatprep.subr.bf16.mxu1 %v4326_v37  ;;  %4038 = vmatprep.subr.bf16.mxu0 %v4326_v37 }
 0x2e2   : > { %3691 = vmatmul.mubr.f32.vlgmr.msra.gmra.mrb[2].mxu0 %v5021_v0 }
 0x2e3   : > { %4034 = vmatpush3.bf16.msra.mxu1 %v5052_v58  ;;  %4040 = vmatpush3.bf16.msra.mxu0 %v4039_v27 }
 0x2e4   : > { %4035 = vmatprep.subr.bf16.mxu1 %v4326_v37  ;;  %4041 = vmatprep.subr.bf16.mxu0 %v4326_v37 }
 0x2e5   : > { %3728 = vmatprep.mubr.msk.f32.mxu0 %vm4327_vm3, %v4328_v10 }
 0x2e7   : > { %4037 = vmatpush3.bf16.msra.mxu1 %v5072_v4  ;;  %4043 = vmatpush3.bf16.msra.mxu0 %v4042_v36 }
 0x2e8   : > { %4044 = vmatprep.subr.bf16.mxu0 %v4326_v37  ;;  %4050 = vmatprep.subr.bf16.mxu1 %v4326_v37 }
 0x2ea   : > { %3710 = vmatmul.mubr.f32.vlgmr.msra.gmra.mrb[2].mxu1 %v2387_v24 }
 0x2eb   : > { %4046 = vmatpush3.bf16.msra.mxu0 %v4045_v45  ;;  %4052 = vmatpush3.bf16.msra.mxu1 %v5017_v56 }
 0x2ec   : > { %4047 = vmatprep.subr.bf16.mxu0 %v4326_v37  ;;  %4053 = vmatprep.subr.bf16.mxu1 %v4326_v37 }
 0x2ed   : > { %3747 = vmatprep.mubr.msk.f32.mxu1 %vm4327_vm3, %v4328_v10 }
 0x2ef   : > { %4049 = vmatpush3.bf16.msra.mxu0 %v4048_v25  ;;  %4055 = vmatpush3.bf16.msra.mxu1 %v5027_v31 }
 0x2f0   : > { %4056 = vmatprep.subr.bf16.mxu1 %v4326_v37 }
 0x2f2   : > { %3729 = vmatmul.mubr.msk.f32.vlgmr.msra.gmra.mrb[4].mxu0 %vm2308_vm8, %v4330_v26 }
 0x2f3   : > { %4058 = vmatpush3.bf16.msra.mxu1 %v5052_v58 }
 0x2f4   : > { %4059 = vmatprep.subr.bf16.mxu1 %v4326_v37 }
 0x2f7   : > { %4061 = vmatpush3.bf16.msra.mxu1 %v5072_v4 }
 0x2fa   : > { %3748 = vmatmul.mubr.msk.f32.vlgmr.msra.gmra.mrb[4].mxu1 %vm2308_vm8, %v4330_v26 }
 0x3a5   : > { %v2391_v28 = vpop.f32.mrb[0].mxu0 }
 0x3a6   : > { %v3654_v20 = vpop.f32.mrb[1].mxu0 }
 0x3ad   : > { %v2502_v56 = vpop.f32.mrb[0].mxu1 }
 0x3ae   : > { %v2503_v19 = vadd.f32 %v2502_v56, %v2391_v28  ;;  %v3673_v10 = vpop.f32.mrb[1].mxu1 }
 0x3b5   : > { %v2590_v60 = vpop.f32.mrb[2].mxu0 }
 0x3b6   : > { %v2591_v0 = vadd.f32 %v2590_v60, %v2503_v19  ;;  %v3692_v32 = vpop.f32.mrb[3].mxu0 }
 0x3bd   : > { %v2671_v12 = vpop.f32.mrb[2].mxu1 }
 0x3be   : > { %v2672_v15 = vadd.f32 %v2671_v12, %v2591_v0  ;;  %v3711_v18 = vpop.f32.mrb[3].mxu1 }
 0x3c5   : > { %v2766_v54 = vpop.f32.mrb[4].mxu0 }
 0x3c6   : > { %v2767_v31 = vadd.f32 %v2766_v54, %v2672_v15  ;;  %v3730_v1 = vpop.f32.mrb[5].mxu0 }
 0x3cc   : > { %2855 = sbr.rel (%p2977_p2) target bundleno = 1008 (0x3f0), region = 36 }
 0x3cd   : > { %v2845_v37 = vpop.f32.mrb[4].mxu1 }
 0x3ce   : > { %v2846_v3 = vadd.f32 %v2845_v37, %v2767_v31  ;;  %v3749_v38 = vpop.f32.mrb[5].mxu1 }
 0x3d0   : > { %v2849_v53 = vadd.f32 %v2846_v3, %v2307_v21 }
 0x3d2   : > { %2851 = vst.msk [vmem:[#allocation5] sm:$0x1] %vm2850_vm9, %v2849_v53 }
 0x3d9   : > { %v2858_v50 = vld [vmem:[#allocation5] sm:$0x1] }
 0x3da   : > { %v2862_v24 = vadd.f32 %v4221_v5, %v2858_v50 }
 0x3dc   : > { %v2978_v6 = vadd.f32 -1.0, %v2862_v24 }
 0x3de   : > { %4222 = vlog2.f32 %v2978_v6 }
 0x3e8   : > { %v4223_v29 = vpop.eup %4222 }
 0x3e9   : > { %v2865_v30 = vmul.f32 0.6931472, %v4223_v29 }
 0x3eb   : > { %v2866_v57 = vadd.f32 %v2865_v30, %v2856_v59 }
 0x3ed   : > { %v2867_v58 = vsub.f32 %v2866_v57, %v2857_v61 }
 0x3ef   : > { %2868 = vst.msk [vmem:[%s4433_s14] sm:$0x1] %vm2850_vm9, %v2867_v58 }
 0x3f0 PF: > { %s2979_s9 = sshll.u32 %s4306_s10, 4  ;;  %s2882_s24 = sshll.u32 %s4433_s14, 4  ;;  %s2883_s24 = int_to_ptr.vmem [resolvable:$true] %s2882_s24 }
 0x3f1   : > { %s5153_s21 = scalar_lea.hbm %s5204_s1, %s2979_s9  ;;  %s2870_s25 = scalar_lea.sflag [#allocation7], %s185_s23 }
 0x3f2   : > { %s4224_s26 = scalar_lea.vmem %s2883_s24, 16  ;;  %s4331_s27 = smov [#allocation6]  }
 0x3f3   : > { %p4225_p4 = scmp.ne.s32.totalorder %s2883_s24, %s4224_s26  ;;  %s4228_s28 = sshll.u32 %s4331_s27, 4  ;;  %s4229_s28 = int_to_ptr.vmem [resolvable:$false] %s4228_s28 }
 0x3f4   : > { %s4230_s29 = scalar_lea.vmem %s4229_s28, 32  ;;  %p4231_p7 = scmp.lt.s32.totalorder %s2883_s24, %s4229_s28 }
 0x3f5   : > { %p4226_p5 = pnand %p4225_p4, %p4391_p3  ;;  %p4232_p8 = scmp.lt.s32.totalorder %s4230_s29, %s4224_s26 }
 0x3f7   : > { %p4227_p6 = pneg %p4226_p5  ;;  %p4233_p10 = por %p4232_p8, %p4231_p7 }
 0x3f9   : > { %p4234_p11 = pnand %p4233_p10, %p4227_p6 }
 0x3fb   : > { %4237 = shalt.err (!%p4234_p11)
}
 0x3fc   : > { %s4238_s10 = scalar_lea.hbm %s5153_s21, 16  ;;  %s4242_s2 = scalar_lea.hbm %s5204_s1, 32 }
 0x3fd   : > { %p4239_p12 = scmp.ne.s32.totalorder %s5153_s21, %s4238_s10  ;;  %p4243_p1 = scmp.lt.u32.totalorder %s5153_s21, %s5204_s1 }
 0x3fe   : > { %p4244_p2 = scmp.lt.u32.totalorder %s4242_s2, %s4238_s10  ;;  %p4246_p5 = scmp.lt.u32.totalorder %s4238_s10, %s5153_s21 }
 0x3ff   : > { %p4240_p13 = pnand %p4239_p12, %p4391_p3 }
 0x400   : > { %p4245_p4 = por %p4244_p2, %p4243_p1 }
 0x401   : > { %p4241_p0 = pneg %p4240_p13 }
 0x402   : > { %p4247_p6 = por %p4246_p5, %p4245_p4 }
 0x404   : > { %p4248_p7 = pnand %p4247_p6, %p4241_p0 }
 0x406   : > { %4251 = shalt.err (!%p4248_p7)
}
 0x407   : > { %4122 = dma.vmem_to_hbm [thread:$0]  (%p4391_p3), %s2883_s24, 16, %s5153_s21, %s2870_s25  }
 0x408 PF: > { %p4128_p8 = scmp.ge.s32.totalorder %s4318_s13, 2  ;;  %s2894_s5 = sand.u32 1, %s4290_s6  }
 0x409   : > { %s2895_s14 = scalar_lea.sflag [#allocation7], %s2894_s5 }
 0x40a   : > { %p4125_p10 = pnand %p4128_p8, %p4401_p9 }
 0x40c   : > { %4285 = dma.done.wait (!%p4125_p10), %s2895_s14, 16  }
 0x40d   : > { %4287 = vsyncadd (!%p4125_p10), %s2895_s14, 4294967280  ;;  %s14_s13 = sadd.s32 1, %s4318_s13   ;;  %s5217_s6 = smov %s4294_s7 }
 0x40e   : > { %p11_p11 = scmp.ge.s32.totalorder %s14_s13, 6   ;;  %s5218_s7 = smov %s4298_s8 }
 0x40f   : > { %s5219_s8 = smov %s4409_s22  ;;  %s5220_s9 = smov %s4310_s11 }
 0x410   : > { %s5221_s10 = smov %s4314_s12  ;;  %s5222_s11 = smov %s5225_s16 }
 0x411   : > { %s5223_s12 = smov %s5229_s17  ;;  %13 = sbr.rel (!%p11_p11) target bundleno = 5 (0x5), region = 71 }
 0x418   :  { %2899 = vsyncpa [#allocation7], 1 }
 0x419   :  { %2901 = vsyncpa [#allocation7 + $0x1], 1 }

</bundles_post_ra>
